<compile_context>
chip_gen: v6e
topology: v6e:2x2x1
jax: 0.10.0
libtpu: 0.0.40
codegen_flags: <defaults>
</compile_context>

<pallas_src>
from functools import partial

import jax
import jax.numpy as jnp
from jax.experimental import pallas as pl
from jax.experimental.pallas import tpu as pltpu

MID = 32          # mid_dim (PyTorch default is 256; small value for the demo)
K = 4
N = 4
M = 4
ACTION_DIM = 2 * M * M          # 32
OUT_PAD = 128                   # lane-dense padded output width
IN_FEAT = 6 * K * N             # 96 features per row/col slab
ROW_PAD = 128                   # each slab zero-padded to a full 128-lane width
IN_W = 2 * ROW_PAD              # fused input slab width: [row | 0 | col | 0]


def _round_up(x, mult):
    return (x + mult - 1) // mult * mult


# Packed-bias layout: widths per segment, offsets 128-lane aligned.
_BIAS_WIDTHS = (16 * MID, 8 * MID, 4 * MID, 2 * MID, MID, MID, 2 * MID, 2 * MID, OUT_PAD)
_BIAS_OFFSETS = []
_off = 0
for _w in _BIAS_WIDTHS:
    _BIAS_OFFSETS.append(_off)
    _off += _round_up(_w, 128)
_BIAS_OFFSETS = tuple(_BIAS_OFFSETS)
_BIAS_TOTAL = _off              # 1664 = 13 * 128 at MID=32


def _leaky_relu(x):
    return jnp.maximum(x, 0.01 * x)


def _hardswish(x):
    return x * jnp.clip(x + 3.0, 0.0, 6.0) * (1.0 / 6.0)


# ----------------------------- Pallas kernel --------------------------------

def policy_net_kernel(
    x_ref, bias_ref,
    w1_ref, w2_ref, wl_ref, w3_ref, w4_ref,
    wd1_ref, wd2_ref, w7_ref, w8_ref,
    out_ref,
):
    def mm(a, w_ref):
        w = w_ref[...]
        # bf16 MXU matmul with f32 accumulate; element-wise math stays f32.
        return jnp.dot(a.astype(w.dtype), w, preferred_element_type=jnp.float32)

    def bias(i):
        off = _BIAS_OFFSETS[i]
        return bias_ref[:, off:off + _BIAS_WIDTHS[i]]

    # Fused BiConvNet branches: 3 matmuls over the lane-concatenated slab.
    t1 = _leaky_relu(mm(x_ref[...], w1_ref) + bias(0)).astype(jnp.bfloat16)   # (TB, 16m)
    t2 = jnp.maximum(mm(t1, w2_ref) + bias(1), 0.0).astype(jnp.bfloat16)      # (TB, 8m)
    x = mm(t2, wl_ref) + bias(2)                                              # xh + xw  (TB, 4m)

    # Trunk
    x = jnp.maximum(x, 0.0)                                                   # ReLU
    x = jnp.maximum(mm(x, w3_ref) + bias(3), 0.0)                             # Lin+ReLU (TB, 2m)
    xa = mm(x, w4_ref) + bias(4)                                              # Linear   (TB, m)

    # DenseNet(m): fused concat matmuls
    d1 = _hardswish(mm(xa, wd1_ref) + bias(5))                                # (TB, m)
    xd = jnp.concatenate([xa, d1], axis=1)                                    # (TB, 2m)
    d2 = _hardswish(mm(xd, wd2_ref) + bias(6))                                # (TB, 2m)

    x7 = jnp.maximum(jnp.concatenate([xd, d2], axis=1), 0.0)                  # (TB, 4m)
    h7 = _hardswish(mm(x7, w7_ref) + bias(7))                                 # (TB, 2m)

    # Padded output columns have zero weight + zero bias -> logits == 0 there,
    # so tanh(0) == 0 and the normalization only sees the real ACTION_DIM lanes.
    logits = mm(h7, w8_ref) + bias(8)                                         # (TB, 128)
    v = jnp.tanh(0.5 * logits)                                                # == (sigmoid-0.5)*2
    nrm2 = jnp.sum(v * v, axis=1, keepdims=True)
    out_ref[...] = v * jax.lax.rsqrt(nrm2 + 1e-12)


# ------------------------- parameter init / prep ----------------------------

def _uniform(key, shape, fan_in):
    bound = float(fan_in) ** -0.5
    return jax.random.uniform(key, shape, jnp.float32, -bound, bound)


def init_params(key, mid=MID):
    m = mid
    keys = iter(jax.random.split(key, 24))

    def lin(out_f, in_f):
        return (_uniform(next(keys), (out_f, in_f), in_f),
                _uniform(next(keys), (out_f,), in_f))

    p = {}
    # BiConvNet cnn_h: Conv2d(6, 2m, (1, N)), Conv2d(2m, m, (1, 1)), Linear(K*m, 4m)
    p['ch1_w'] = _uniform(next(keys), (2 * m, 6, 1, N), 6 * N)
    p['ch1_b'] = _uniform(next(keys), (2 * m,), 6 * N)
    p['ch2_w'] = _uniform(next(keys), (m, 2 * m, 1, 1), 2 * m)
    p['ch2_b'] = _uniform(next(keys), (m,), 2 * m)
    p['lh_w'], p['lh_b'] = lin(4 * m, K * m)
    # BiConvNet cnn_w: Conv2d(6, 2m, (K, 1)), Conv2d(2m, m, (1, 1)), Linear(N*m, 4m)
    p['cw1_w'] = _uniform(next(keys), (2 * m, 6, K, 1), 6 * K)
    p['cw1_b'] = _uniform(next(keys), (2 * m,), 6 * K)
    p['cw2_w'] = _uniform(next(keys), (m, 2 * m, 1, 1), 2 * m)
    p['cw2_b'] = _uniform(next(keys), (m,), 2 * m)
    p['lw_w'], p['lw_b'] = lin(4 * m, N * m)
    # Trunk
    p['w3'], p['b3'] = lin(2 * m, 4 * m)
    p['w4'], p['b4'] = lin(m, 2 * m)
    p['wd1'], p['bd1'] = lin(m, m)
    p['wd2'], p['bd2'] = lin(2 * m, 2 * m)
    p['w7'], p['b7'] = lin(2 * m, 4 * m)
    p['w8'], p['b8'] = lin(ACTION_DIM, 2 * m)
    return p


def prepare_kernel_weights(p, mid=MID):
    m = mid
    eyeK = jnp.eye(K, dtype=jnp.float32)
    eyeN = jnp.eye(N, dtype=jnp.float32)
    bf = lambda a: a.astype(jnp.bfloat16)

    # --- BiConvNet, both branches fused over the lane-concatenated input slab ---
    # First convs (1,N)/(K,1) as block-diagonal linears over the 96-wide slabs,
    # placed block-diagonally across the two 128-lane halves of the input.
    wh1 = jnp.kron(eyeK, p['ch1_w'].reshape(2 * m, 6 * N).T)      # (96, 8m), row idx h*24+c*4+n
    ww1 = jnp.kron(eyeN, p['cw1_w'].reshape(2 * m, 6 * K).T)      # (96, 8m), row idx w*24+c*4+h
    w1 = jnp.zeros((IN_W, 16 * m), jnp.float32)
    w1 = w1.at[:IN_FEAT, :8 * m].set(wh1)
    w1 = w1.at[ROW_PAD:ROW_PAD + IN_FEAT, 8 * m:].set(ww1)
    b1 = jnp.concatenate([jnp.tile(p['ch1_b'], K),
                          jnp.tile(p['cw1_b'], N)]).reshape(1, 16 * m)

    # 1x1 convs as block-diagonal linears, fused block-diagonally across branches.
    wh2 = jnp.kron(eyeK, p['ch2_w'].reshape(m, 2 * m).T)          # (8m, 4m)
    ww2 = jnp.kron(eyeN, p['cw2_w'].reshape(m, 2 * m).T)          # (8m, 4m)
    w2 = jnp.zeros((16 * m, 8 * m), jnp.float32)
    w2 = w2.at[:8 * m, :4 * m].set(wh2)
    w2 = w2.at[8 * m:, 4 * m:].set(ww2)
    b2 = jnp.concatenate([jnp.tile(p['ch2_b'], K),
                          jnp.tile(p['cw2_b'], N)]).reshape(1, 8 * m)

    # linear_h / linear_w stacked -> one (8m, 4m) matmul that also folds xh + xw.
    lh = p['lh_w'].reshape(4 * m, m, K).transpose(2, 1, 0).reshape(K * m, 4 * m)
    lw = p['lw_w'].reshape(4 * m, m, N).transpose(2, 1, 0).reshape(N * m, 4 * m)
    wl = jnp.concatenate([lh, lw], axis=0)                        # (8m, 4m)
    bl = (p['lh_b'] + p['lw_b']).reshape(1, 4 * m)

    # --- trunk (DenseNet / final concats handled via in-kernel lane concats) ---
    w3 = p['w3'].T; b3 = p['b3'].reshape(1, -1)
    w4 = p['w4'].T; b4 = p['b4'].reshape(1, -1)
    wd1 = p['wd1'].T; bd1 = p['bd1'].reshape(1, -1)
    wd2 = p['wd2'].T; bd2 = p['bd2'].reshape(1, -1)               # (2m, 2m)
    w7 = p['w7'].T; b7 = p['b7'].reshape(1, -1)                   # (4m, 2m)
    # output layer padded to a lane-dense 128-wide slab (pad cols exactly zero)
    w8 = jnp.zeros((2 * m, OUT_PAD), jnp.float32).at[:, :ACTION_DIM].set(p['w8'].T)
    b8 = jnp.zeros((1, OUT_PAD), jnp.float32).at[:, :ACTION_DIM].set(p['b8'])

    # Pack all biases into one lane-aligned f32 slab (single pipelined operand).
    bias_packed = jnp.zeros((1, _BIAS_TOTAL), jnp.float32)
    for off, b in zip(_BIAS_OFFSETS, (b1, b2, bl, b3, b4, bd1, bd2, b7, b8)):
        bias_packed = bias_packed.at[:, off:off + b.shape[1]].set(b)

    weights = tuple(bf(w) for w in (w1, w2, wl, w3, w4, wd1, wd2, w7, w8))
    return (bias_packed,) + weights


# ------------------------------- wrapper -------------------------------------

@partial(jax.jit, static_argnames=("tile_b",))
def policy_net_mimo_relay(mat_H, mat_W, kernel_weights, tile_b=512):
    B = mat_H.shape[0]
    Hr = jnp.real(mat_H).astype(jnp.float32)
    Hi = jnp.imag(mat_H).astype(jnp.float32)
    Wr = jnp.real(mat_W).astype(jnp.float32)
    Wi = jnp.imag(mat_W).astype(jnp.float32)

    # HF = H @ W^H in XLA (cheap, lane-friendly), then pack one lane-dense slab.
    HF = jnp.einsum('bkn,bmn->bkm', mat_H, jnp.conj(mat_W))
    HFr = jnp.real(HF).astype(jnp.float32)
    HFi = jnp.imag(HF).astype(jnp.float32)

    X = jnp.stack([Hr, Hi, Wr, Wi, HFr, HFi], axis=1)                 # (B, 6, K, N)
    row_slab = jnp.transpose(X, (0, 2, 1, 3)).reshape(B, IN_FEAT)     # idx h*24+c*4+n
    col_slab = jnp.transpose(X, (0, 3, 1, 2)).reshape(B, IN_FEAT)     # idx w*24+c*4+h
    zpad = jnp.zeros((B, ROW_PAD - IN_FEAT), jnp.float32)
    slab = jnp.concatenate([row_slab, zpad, col_slab, zpad], axis=1)  # (B, 256) lane-dense
    slab = slab.astype(jnp.bfloat16)

    # Batch tiling: >=2 grid steps (so v7x's 2 TensorCores both get work), tiles are
    # multiples of 16 (bf16 sublane packing), padding capped at ~steps*16 rows.
    steps = max(2, -(-B // tile_b))
    tb = _round_up(-(-B // steps), 16)
    Bp = steps * tb
    if Bp != B:
        slab = jnp.pad(slab, ((0, Bp - B), (0, 0)))

    bias_packed = kernel_weights[0]
    weights = list(kernel_weights[1:])
    args = [slab, bias_packed] + weights
    in_specs = (
        [pl.BlockSpec((tb, IN_W), lambda i: (i, 0)),
         pl.BlockSpec(bias_packed.shape, lambda i: (0, 0))]
        + [pl.BlockSpec(w.shape, lambda i: (0, 0)) for w in weights]
    )
    # TODO(synk): at production mid_dim=256, single-buffer the weight operands
    # (pipeline_mode=pl.Buffered(1)) and set vmem_limit_bytes explicitly for v7x's
    # 64 MiB VMEM; negligible at the demo MID=32 so left at defaults here.

    mac = sum(int(w.shape[0]) * int(w.shape[1]) for w in weights)
    w_bytes = sum(int(w.size) * w.dtype.itemsize for w in kernel_weights)
    cost = pl.CostEstimate(
        flops=int(2 * mac * Bp),
        transcendentals=int((OUT_PAD + 1) * Bp),
        bytes_accessed=int(Bp * IN_W * 2 + Bp * OUT_PAD * 4 + w_bytes),
    )

    out_pad = pl.pallas_call(
        policy_net_kernel,
        out_shape=jax.ShapeDtypeStruct((Bp, OUT_PAD), jnp.float32),
        grid=(steps,),
        in_specs=in_specs,
        out_specs=pl.BlockSpec((tb, OUT_PAD), lambda i: (i, 0)),
        compiler_params=pltpu.CompilerParams(dimension_semantics=("parallel",)),
        cost_estimate=cost,
    )(*args)

    vec = out_pad[:B, :ACTION_DIM]
    F = vec[:, :M * M] + 1j * vec[:, M * M:]
    return F.reshape(B, M, M).astype(jnp.complex64)


# --------------------------- pure-JAX reference -------------------------------

def reference_forward(mat_H, mat_W, p, mid=MID):
    B = mat_H.shape[0]
    Hr, Hi = jnp.real(mat_H), jnp.imag(mat_H)
    Wr, Wi = jnp.real(mat_W), jnp.imag(mat_W)
    vec_H = jnp.concatenate([Hr.reshape(B, -1), Hi.reshape(B, -1)], 1)
    vec_W = jnp.concatenate([Wr.reshape(B, -1), Wi.reshape(B, -1)], 1)
    HF = jnp.einsum('bkn,bmn->bkm', mat_H, jnp.conj(mat_W))
    vec_HF = jnp.concatenate([jnp.real(HF).reshape(B, -1), jnp.imag(HF).reshape(B, -1)], 1)
    x = jnp.concatenate([vec_H, vec_W, vec_HF], 1).reshape(B, 6, K, N).astype(jnp.float32)

    def conv2d(t, w, b):
        y = jax.lax.conv_general_dilated(t, w, (1, 1), 'VALID',
                                         dimension_numbers=('NCHW', 'OIHW', 'NCHW'))
        return y + b[None, :, None, None]

    lrelu = lambda t: jnp.where(t >= 0, t, 0.01 * t)
    hsw = lambda t: t * jnp.clip(t + 3.0, 0.0, 6.0) / 6.0

    ch = jnp.maximum(conv2d(lrelu(conv2d(x, p['ch1_w'], p['ch1_b'])), p['ch2_w'], p['ch2_b']), 0.0)
    xh = ch.reshape(B, -1) @ p['lh_w'].T + p['lh_b']
    cw = jnp.maximum(conv2d(lrelu(conv2d(x, p['cw1_w'], p['cw1_b'])), p['cw2_w'], p['cw2_b']), 0.0)
    xw = cw.reshape(B, -1) @ p['lw_w'].T + p['lw_b']
    y = jnp.maximum(xh + xw, 0.0)
    y = jnp.maximum(y @ p['w3'].T + p['b3'], 0.0)
    y = y @ p['w4'].T + p['b4']
    d1 = hsw(y @ p['wd1'].T + p['bd1'])
    y2 = jnp.concatenate([y, d1], 1)
    d2 = hsw(y2 @ p['wd2'].T + p['bd2'])
    y3 = jnp.concatenate([y2, d2], 1)
    y = jnp.maximum(y3, 0.0)
    y = hsw(y @ p['w7'].T + p['b7'])
    y = y @ p['w8'].T + p['b8']
    v = (jax.nn.sigmoid(y) - 0.5) * 2.0
    v = v / jnp.linalg.norm(v, axis=1, keepdims=True)
    F = v[:, :M * M] + 1j * v[:, M * M:]
    return F.reshape(B, M, M)


# --------------------------------- main ---------------------------------------

if __name__ == "__main__":
    key = jax.random.PRNGKey(0)
    kp, kh, kw = jax.random.split(key, 3)
    params = init_params(kp)
    kernel_weights = prepare_kernel_weights(params)

    B = 2
    h = jax.random.normal(kh, (B, K, N, 2), jnp.float32)
    w = jax.random.normal(kw, (B, K, N, 2), jnp.float32)
    mat_H = (h[..., 0] + 1j * h[..., 1]).astype(jnp.complex64)
    mat_W = (w[..., 0] + 1j * w[..., 1]).astype(jnp.complex64)

    out = policy_net_mimo_relay(mat_H, mat_W, kernel_weights)
    out = jax.block_until_ready(out)

    assert out.shape == (B, M, M) and out.dtype == jnp.complex64
    assert bool(jnp.all(jnp.isfinite(out.real)) & jnp.all(jnp.isfinite(out.imag)))

    ref = reference_forward(mat_H, mat_W, params)
    max_err = float(jnp.max(jnp.abs(out - ref)))
    assert max_err < 5e-2, f"mismatch vs reference: {max_err}"

    print("KERNEL_OK")
</pallas_src>

<mosaic_0001>
module attributes {stable_mosaic.version = 11 : i64} {
  func.func @policy_net_kernel(%arg0: i32, %arg1: memref<16x256xbf16, #tpu.memory_space<vmem>>, %arg2: memref<1x1664xf32, #tpu.memory_space<vmem>>, %arg3: memref<256x512xbf16, #tpu.memory_space<vmem>>, %arg4: memref<512x256xbf16, #tpu.memory_space<vmem>>, %arg5: memref<256x128xbf16, #tpu.memory_space<vmem>>, %arg6: memref<128x64xbf16, #tpu.memory_space<vmem>>, %arg7: memref<64x32xbf16, #tpu.memory_space<vmem>>, %arg8: memref<32x32xbf16, #tpu.memory_space<vmem>>, %arg9: memref<64x64xbf16, #tpu.memory_space<vmem>>, %arg10: memref<128x64xbf16, #tpu.memory_space<vmem>>, %arg11: memref<64x128xbf16, #tpu.memory_space<vmem>>, %arg12: memref<16x128xf32, #tpu.memory_space<vmem>>) attributes {dimension_semantics = [#tpu.dimension_semantics<parallel>], iteration_bounds = array<i64: 2>, scalar_prefetch = 0 : i64, scratch_operands = 0 : i64, tpu.core_type = #tpu.core_type<tc>, window_params = [{transform_indices = @transform_0, window_bounds = array<i64: 16, 256>}, {pipeline_mode = #tpu.pipeline_mode<synchronous>, transform_indices = @transform_1, window_bounds = array<i64: 1, 1664>}, {pipeline_mode = #tpu.pipeline_mode<synchronous>, transform_indices = @transform_2, window_bounds = array<i64: 256, 512>}, {pipeline_mode = #tpu.pipeline_mode<synchronous>, transform_indices = @transform_3, window_bounds = array<i64: 512, 256>}, {pipeline_mode = #tpu.pipeline_mode<synchronous>, transform_indices = @transform_4, window_bounds = array<i64: 256, 128>}, {pipeline_mode = #tpu.pipeline_mode<synchronous>, transform_indices = @transform_5, window_bounds = array<i64: 128, 64>}, {pipeline_mode = #tpu.pipeline_mode<synchronous>, transform_indices = @transform_6, window_bounds = array<i64: 64, 32>}, {pipeline_mode = #tpu.pipeline_mode<synchronous>, transform_indices = @transform_7, window_bounds = array<i64: 32, 32>}, {pipeline_mode = #tpu.pipeline_mode<synchronous>, transform_indices = @transform_8, window_bounds = array<i64: 64, 64>}, {pipeline_mode = #tpu.pipeline_mode<synchronous>, transform_indices = @transform_9, window_bounds = array<i64: 128, 64>}, {pipeline_mode = #tpu.pipeline_mode<synchronous>, transform_indices = @transform_10, window_bounds = array<i64: 64, 128>}, {transform_indices = @transform_11, window_bounds = array<i64: 16, 128>}]} {
    %c0 = arith.constant 0 : index
    %c0_0 = arith.constant 0 : index
    %0 = vector.load %arg1[%c0, %c0_0] : memref<16x256xbf16, #tpu.memory_space<vmem>>, vector<16x256xbf16>
    %c0_1 = arith.constant 0 : index
    %c0_2 = arith.constant 0 : index
    %1 = vector.load %arg3[%c0_1, %c0_2] : memref<256x512xbf16, #tpu.memory_space<vmem>>, vector<256x512xbf16>
    %cst = arith.constant dense<0.000000e+00> : vector<16x512xf32>
    %2 = tpu.matmul %0, %1, %cst {dimension_numbers = #tpu.dot_dimension_numbers<[1], [0], [0], [1], [0, 0, 1, 1], [], []>} : vector<16x256xbf16>, vector<256x512xbf16>, vector<16x512xf32> -> vector<16x512xf32>
    %c0_3 = arith.constant 0 : index
    %c0_4 = arith.constant 0 : index
    %3 = vector.load %arg2[%c0_3, %c0_4] : memref<1x1664xf32, #tpu.memory_space<vmem>>, vector<1x512xf32>
    %4 = vector.broadcast %3 : vector<1x512xf32> to vector<16x512xf32>
    %5 = arith.addf %2, %4 : vector<16x512xf32>
    %cst_5 = arith.constant 0.00999999977 : f32
    %6 = vector.broadcast %cst_5 : f32 to vector<16x512xf32>
    %7 = arith.mulf %6, %5 : vector<16x512xf32>
    %8 = arith.maximumf %5, %7 : vector<16x512xf32>
    %9 = arith.truncf %8 : vector<16x512xf32> to vector<16x512xbf16>
    %c0_6 = arith.constant 0 : index
    %c0_7 = arith.constant 0 : index
    %10 = vector.load %arg4[%c0_6, %c0_7] : memref<512x256xbf16, #tpu.memory_space<vmem>>, vector<512x256xbf16>
    %cst_8 = arith.constant dense<0.000000e+00> : vector<16x256xf32>
    %11 = tpu.matmul %9, %10, %cst_8 {dimension_numbers = #tpu.dot_dimension_numbers<[1], [0], [0], [1], [0, 0, 1, 1], [], []>} : vector<16x512xbf16>, vector<512x256xbf16>, vector<16x256xf32> -> vector<16x256xf32>
    %c0_9 = arith.constant 0 : index
    %c512 = arith.constant 512 : index
    %12 = vector.load %arg2[%c0_9, %c512] : memref<1x1664xf32, #tpu.memory_space<vmem>>, vector<1x256xf32>
    %13 = vector.broadcast %12 : vector<1x256xf32> to vector<16x256xf32>
    %14 = arith.addf %11, %13 : vector<16x256xf32>
    %cst_10 = arith.constant 0.000000e+00 : f32
    %15 = vector.broadcast %cst_10 : f32 to vector<16x256xf32>
    %16 = arith.maximumf %14, %15 : vector<16x256xf32>
    %17 = arith.truncf %16 : vector<16x256xf32> to vector<16x256xbf16>
    %c0_11 = arith.constant 0 : index
    %c0_12 = arith.constant 0 : index
    %18 = vector.load %arg5[%c0_11, %c0_12] : memref<256x128xbf16, #tpu.memory_space<vmem>>, vector<256x128xbf16>
    %cst_13 = arith.constant dense<0.000000e+00> : vector<16x128xf32>
    %19 = tpu.matmul %17, %18, %cst_13 {dimension_numbers = #tpu.dot_dimension_numbers<[1], [0], [0], [1], [0, 0, 1, 1], [], []>} : vector<16x256xbf16>, vector<256x128xbf16>, vector<16x128xf32> -> vector<16x128xf32>
    %c0_14 = arith.constant 0 : index
    %c768 = arith.constant 768 : index
    %20 = vector.load %arg2[%c0_14, %c768] : memref<1x1664xf32, #tpu.memory_space<vmem>>, vector<1x128xf32>
    %21 = vector.broadcast %20 : vector<1x128xf32> to vector<16x128xf32>
    %22 = arith.addf %19, %21 : vector<16x128xf32>
    %cst_15 = arith.constant 0.000000e+00 : f32
    %23 = vector.broadcast %cst_15 : f32 to vector<16x128xf32>
    %24 = arith.maximumf %22, %23 : vector<16x128xf32>
    %c0_16 = arith.constant 0 : index
    %c0_17 = arith.constant 0 : index
    %25 = vector.load %arg6[%c0_16, %c0_17] : memref<128x64xbf16, #tpu.memory_space<vmem>>, vector<128x64xbf16>
    %26 = arith.truncf %24 : vector<16x128xf32> to vector<16x128xbf16>
    %cst_18 = arith.constant dense<0.000000e+00> : vector<16x64xf32>
    %27 = tpu.matmul %26, %25, %cst_18 {dimension_numbers = #tpu.dot_dimension_numbers<[1], [0], [0], [1], [0, 0, 1, 1], [], []>} : vector<16x128xbf16>, vector<128x64xbf16>, vector<16x64xf32> -> vector<16x64xf32>
    %c0_19 = arith.constant 0 : index
    %c896 = arith.constant 896 : index
    %28 = vector.load %arg2[%c0_19, %c896] : memref<1x1664xf32, #tpu.memory_space<vmem>>, vector<1x64xf32>
    %29 = vector.broadcast %28 : vector<1x64xf32> to vector<16x64xf32>
    %30 = arith.addf %27, %29 : vector<16x64xf32>
    %cst_20 = arith.constant 0.000000e+00 : f32
    %31 = vector.broadcast %cst_20 : f32 to vector<16x64xf32>
    %32 = arith.maximumf %30, %31 : vector<16x64xf32>
    %c0_21 = arith.constant 0 : index
    %c0_22 = arith.constant 0 : index
    %33 = vector.load %arg7[%c0_21, %c0_22] : memref<64x32xbf16, #tpu.memory_space<vmem>>, vector<64x32xbf16>
    %34 = arith.truncf %32 : vector<16x64xf32> to vector<16x64xbf16>
    %cst_23 = arith.constant dense<0.000000e+00> : vector<16x32xf32>
    %35 = tpu.matmul %34, %33, %cst_23 {dimension_numbers = #tpu.dot_dimension_numbers<[1], [0], [0], [1], [0, 0, 1, 1], [], []>} : vector<16x64xbf16>, vector<64x32xbf16>, vector<16x32xf32> -> vector<16x32xf32>
    %c0_24 = arith.constant 0 : index
    %c1024 = arith.constant 1024 : index
    %36 = vector.load %arg2[%c0_24, %c1024] : memref<1x1664xf32, #tpu.memory_space<vmem>>, vector<1x32xf32>
    %37 = vector.broadcast %36 : vector<1x32xf32> to vector<16x32xf32>
    %38 = arith.addf %35, %37 : vector<16x32xf32>
    %c0_25 = arith.constant 0 : index
    %c0_26 = arith.constant 0 : index
    %39 = vector.load %arg8[%c0_25, %c0_26] : memref<32x32xbf16, #tpu.memory_space<vmem>>, vector<32x32xbf16>
    %40 = arith.truncf %38 : vector<16x32xf32> to vector<16x32xbf16>
    %cst_27 = arith.constant dense<0.000000e+00> : vector<16x32xf32>
    %41 = tpu.matmul %40, %39, %cst_27 {dimension_numbers = #tpu.dot_dimension_numbers<[1], [0], [0], [1], [0, 0, 1, 1], [], []>} : vector<16x32xbf16>, vector<32x32xbf16>, vector<16x32xf32> -> vector<16x32xf32>
    %c0_28 = arith.constant 0 : index
    %c1152 = arith.constant 1152 : index
    %42 = vector.load %arg2[%c0_28, %c1152] : memref<1x1664xf32, #tpu.memory_space<vmem>>, vector<1x32xf32>
    %43 = vector.broadcast %42 : vector<1x32xf32> to vector<16x32xf32>
    %44 = arith.addf %41, %43 : vector<16x32xf32>
    %cst_29 = arith.constant 3.000000e+00 : f32
    %45 = vector.broadcast %cst_29 : f32 to vector<16x32xf32>
    %46 = arith.addf %44, %45 : vector<16x32xf32>
    %cst_30 = arith.constant 0.000000e+00 : f32
    %cst_31 = arith.constant 6.000000e+00 : f32
    %47 = vector.broadcast %cst_30 : f32 to vector<16x32xf32>
    %48 = arith.maximumf %47, %46 : vector<16x32xf32>
    %49 = vector.broadcast %cst_31 : f32 to vector<16x32xf32>
    %50 = arith.minimumf %49, %48 : vector<16x32xf32>
    %51 = arith.mulf %44, %50 : vector<16x32xf32>
    %cst_32 = arith.constant 0.166666672 : f32
    %52 = vector.broadcast %cst_32 : f32 to vector<16x32xf32>
    %53 = arith.mulf %51, %52 : vector<16x32xf32>
    %54 = tpu.concatenate %38, %53 in 1 : vector<16x32xf32>, vector<16x32xf32> -> vector<16x64xf32>
    %c0_33 = arith.constant 0 : index
    %c0_34 = arith.constant 0 : index
    %55 = vector.load %arg9[%c0_33, %c0_34] : memref<64x64xbf16, #tpu.memory_space<vmem>>, vector<64x64xbf16>
    %56 = arith.truncf %54 : vector<16x64xf32> to vector<16x64xbf16>
    %cst_35 = arith.constant dense<0.000000e+00> : vector<16x64xf32>
    %57 = tpu.matmul %56, %55, %cst_35 {dimension_numbers = #tpu.dot_dimension_numbers<[1], [0], [0], [1], [0, 0, 1, 1], [], []>} : vector<16x64xbf16>, vector<64x64xbf16>, vector<16x64xf32> -> vector<16x64xf32>
    %c0_36 = arith.constant 0 : index
    %c1280 = arith.constant 1280 : index
    %58 = vector.load %arg2[%c0_36, %c1280] : memref<1x1664xf32, #tpu.memory_space<vmem>>, vector<1x64xf32>
    %59 = vector.broadcast %58 : vector<1x64xf32> to vector<16x64xf32>
    %60 = arith.addf %57, %59 : vector<16x64xf32>
    %cst_37 = arith.constant 3.000000e+00 : f32
    %61 = vector.broadcast %cst_37 : f32 to vector<16x64xf32>
    %62 = arith.addf %60, %61 : vector<16x64xf32>
    %cst_38 = arith.constant 0.000000e+00 : f32
    %cst_39 = arith.constant 6.000000e+00 : f32
    %63 = vector.broadcast %cst_38 : f32 to vector<16x64xf32>
    %64 = arith.maximumf %63, %62 : vector<16x64xf32>
    %65 = vector.broadcast %cst_39 : f32 to vector<16x64xf32>
    %66 = arith.minimumf %65, %64 : vector<16x64xf32>
    %67 = arith.mulf %60, %66 : vector<16x64xf32>
    %cst_40 = arith.constant 0.166666672 : f32
    %68 = vector.broadcast %cst_40 : f32 to vector<16x64xf32>
    %69 = arith.mulf %67, %68 : vector<16x64xf32>
    %70 = tpu.concatenate %54, %69 in 1 : vector<16x64xf32>, vector<16x64xf32> -> vector<16x128xf32>
    %cst_41 = arith.constant 0.000000e+00 : f32
    %71 = vector.broadcast %cst_41 : f32 to vector<16x128xf32>
    %72 = arith.maximumf %70, %71 : vector<16x128xf32>
    %c0_42 = arith.constant 0 : index
    %c0_43 = arith.constant 0 : index
    %73 = vector.load %arg10[%c0_42, %c0_43] : memref<128x64xbf16, #tpu.memory_space<vmem>>, vector<128x64xbf16>
    %74 = arith.truncf %72 : vector<16x128xf32> to vector<16x128xbf16>
    %cst_44 = arith.constant dense<0.000000e+00> : vector<16x64xf32>
    %75 = tpu.matmul %74, %73, %cst_44 {dimension_numbers = #tpu.dot_dimension_numbers<[1], [0], [0], [1], [0, 0, 1, 1], [], []>} : vector<16x128xbf16>, vector<128x64xbf16>, vector<16x64xf32> -> vector<16x64xf32>
    %c0_45 = arith.constant 0 : index
    %c1408 = arith.constant 1408 : index
    %76 = vector.load %arg2[%c0_45, %c1408] : memref<1x1664xf32, #tpu.memory_space<vmem>>, vector<1x64xf32>
    %77 = vector.broadcast %76 : vector<1x64xf32> to vector<16x64xf32>
    %78 = arith.addf %75, %77 : vector<16x64xf32>
    %cst_46 = arith.constant 3.000000e+00 : f32
    %79 = vector.broadcast %cst_46 : f32 to vector<16x64xf32>
    %80 = arith.addf %78, %79 : vector<16x64xf32>
    %cst_47 = arith.constant 0.000000e+00 : f32
    %cst_48 = arith.constant 6.000000e+00 : f32
    %81 = vector.broadcast %cst_47 : f32 to vector<16x64xf32>
    %82 = arith.maximumf %81, %80 : vector<16x64xf32>
    %83 = vector.broadcast %cst_48 : f32 to vector<16x64xf32>
    %84 = arith.minimumf %83, %82 : vector<16x64xf32>
    %85 = arith.mulf %78, %84 : vector<16x64xf32>
    %cst_49 = arith.constant 0.166666672 : f32
    %86 = vector.broadcast %cst_49 : f32 to vector<16x64xf32>
    %87 = arith.mulf %85, %86 : vector<16x64xf32>
    %c0_50 = arith.constant 0 : index
    %c0_51 = arith.constant 0 : index
    %88 = vector.load %arg11[%c0_50, %c0_51] : memref<64x128xbf16, #tpu.memory_space<vmem>>, vector<64x128xbf16>
    %89 = arith.truncf %87 : vector<16x64xf32> to vector<16x64xbf16>
    %cst_52 = arith.constant dense<0.000000e+00> : vector<16x128xf32>
    %90 = tpu.matmul %89, %88, %cst_52 {dimension_numbers = #tpu.dot_dimension_numbers<[1], [0], [0], [1], [0, 0, 1, 1], [], []>} : vector<16x64xbf16>, vector<64x128xbf16>, vector<16x128xf32> -> vector<16x128xf32>
    %c0_53 = arith.constant 0 : index
    %c1536 = arith.constant 1536 : index
    %91 = vector.load %arg2[%c0_53, %c1536] : memref<1x1664xf32, #tpu.memory_space<vmem>>, vector<1x128xf32>
    %92 = vector.broadcast %91 : vector<1x128xf32> to vector<16x128xf32>
    %93 = arith.addf %90, %92 : vector<16x128xf32>
    %cst_54 = arith.constant 5.000000e-01 : f32
    %94 = vector.broadcast %cst_54 : f32 to vector<16x128xf32>
    %95 = arith.mulf %94, %93 : vector<16x128xf32>
    %96 = math.tanh %95 : vector<16x128xf32>
    %97 = arith.mulf %96, %96 : vector<16x128xf32>
    %cst_55 = arith.constant dense<0.000000e+00> : vector<16xf32>
    %98 = vector.multi_reduction <add>, %97, %cst_55 [1] : vector<16x128xf32> to vector<16xf32>
    %99 = vector.shape_cast %98 : vector<16xf32> to vector<16x1xf32>
    %cst_56 = arith.constant 9.99999996E-13 : f32
    %100 = vector.broadcast %cst_56 : f32 to vector<16x1xf32>
    %101 = arith.addf %99, %100 : vector<16x1xf32>
    %102 = math.rsqrt %101 : vector<16x1xf32>
    %103 = vector.broadcast %102 : vector<16x1xf32> to vector<16x128xf32>
    %104 = arith.mulf %96, %103 : vector<16x128xf32>
    %c0_57 = arith.constant 0 : index
    %c0_58 = arith.constant 0 : index
    %105 = vector.load %arg12[%c0_57, %c0_58] : memref<16x128xf32, #tpu.memory_space<vmem>>, vector<16x128xf32>
    tpu.vector_store %arg12[%c0_57, %c0_58], %104 {strides = array<i32>} : memref<16x128xf32, #tpu.memory_space<vmem>>, vector<16x128xf32>,
    return
  }
  func.func @transform_0(%arg0: i32) -> (i32, i32) {
    %c0_i32 = arith.constant 0 : i32
    %c0_i32_0 = arith.constant 0 : i32
    return %arg0, %c0_i32 : i32, i32
  }
  func.func @transform_1(%arg0: i32) -> (i32, i32) {
    %c0_i32 = arith.constant 0 : i32
    %c0_i32_0 = arith.constant 0 : i32
    %c0_i32_1 = arith.constant 0 : i32
    return %c0_i32, %c0_i32_0 : i32, i32
  }
  func.func @transform_2(%arg0: i32) -> (i32, i32) {
    %c0_i32 = arith.constant 0 : i32
    %c0_i32_0 = arith.constant 0 : i32
    %c0_i32_1 = arith.constant 0 : i32
    return %c0_i32, %c0_i32_0 : i32, i32
  }
  func.func @transform_3(%arg0: i32) -> (i32, i32) {
    %c0_i32 = arith.constant 0 : i32
    %c0_i32_0 = arith.constant 0 : i32
    %c0_i32_1 = arith.constant 0 : i32
    return %c0_i32, %c0_i32_0 : i32, i32
  }
  func.func @transform_4(%arg0: i32) -> (i32, i32) {
    %c0_i32 = arith.constant 0 : i32
    %c0_i32_0 = arith.constant 0 : i32
    %c0_i32_1 = arith.constant 0 : i32
    return %c0_i32, %c0_i32_0 : i32, i32
  }
  func.func @transform_5(%arg0: i32) -> (i32, i32) {
    %c0_i32 = arith.constant 0 : i32
    %c0_i32_0 = arith.constant 0 : i32
    %c0_i32_1 = arith.constant 0 : i32
    return %c0_i32, %c0_i32_0 : i32, i32
  }
  func.func @transform_6(%arg0: i32) -> (i32, i32) {
    %c0_i32 = arith.constant 0 : i32
    %c0_i32_0 = arith.constant 0 : i32
    %c0_i32_1 = arith.constant 0 : i32
    return %c0_i32, %c0_i32_0 : i32, i32
  }
  func.func @transform_7(%arg0: i32) -> (i32, i32) {
    %c0_i32 = arith.constant 0 : i32
    %c0_i32_0 = arith.constant 0 : i32
    %c0_i32_1 = arith.constant 0 : i32
    return %c0_i32, %c0_i32_0 : i32, i32
  }
  func.func @transform_8(%arg0: i32) -> (i32, i32) {
    %c0_i32 = arith.constant 0 : i32
    %c0_i32_0 = arith.constant 0 : i32
    %c0_i32_1 = arith.constant 0 : i32
    return %c0_i32, %c0_i32_0 : i32, i32
  }
  func.func @transform_9(%arg0: i32) -> (i32, i32) {
    %c0_i32 = arith.constant 0 : i32
    %c0_i32_0 = arith.constant 0 : i32
    %c0_i32_1 = arith.constant 0 : i32
    return %c0_i32, %c0_i32_0 : i32, i32
  }
  func.func @transform_10(%arg0: i32) -> (i32, i32) {
    %c0_i32 = arith.constant 0 : i32
    %c0_i32_0 = arith.constant 0 : i32
    %c0_i32_1 = arith.constant 0 : i32
    return %c0_i32, %c0_i32_0 : i32, i32
  }
  func.func @transform_11(%arg0: i32) -> (i32, i32) {
    %c0_i32 = arith.constant 0 : i32
    %c0_i32_0 = arith.constant 0 : i32
    return %arg0, %c0_i32 : i32, i32
  }
}

</mosaic_0001>

<bundles_post_ra>
// kernel: custom-call.2
= control target key start
LH: loop header
LB: loop body
LE: loop exit
PB: predicated region body
PF: predicated region fallthrough
CT: control target
= control target key end

     0   :  { %2 = vsyncpa [#allocation0], 0  ;;  %s47_s0 = inlined_call_operand.hbm [shape: c64[2,4,4], index: 0, kind: input, shape index: {}]   ;;  %s48_s1 = inlined_call_operand.vmem [shape: f32[2,4,4], index: 1, kind: output, shape index: {}]  }
   0x1   :  { %s3_s8 = sshll.u32 %s48_s1, 4  ;;  %s4_s8 = int_to_ptr.vmem [resolvable:$true] %s3_s8 }
   0x2   :  { %s17_s9 = scalar_lea.vmem %s4_s8, 128  ;;  %p22_p1 = scmp.lt.s32.totalorder %s4_s8, %s4_s8 }
   0x3   :  { %p18_p0 = scmp.ne.s32.totalorder %s4_s8, %s17_s9  ;;  %p23_p2 = scmp.lt.s32.totalorder %s17_s9, %s17_s9 }
   0x5   :  { %p24_p3 = por %p23_p2, %p22_p1 }
   0x7   :  { %p25_p4 = pnand %p24_p3, %p18_p0 }
   0x9   :  { %28 = shalt.err (!%p25_p4)  }
   0xa   :  { %6 = dma.hbm_to_vmem [thread:$0]  %s47_s0, 128, %s4_s8, [#allocation0] }
   0xb   :  { %29 = dma.done.wait [#allocation0], 128  }
   0xc   :  { %30 = vsyncadd [#allocation0], 4294967168 }
   0xd   :  { %8 = vsyncpa [#allocation0], 1 }

// kernel: custom-call.1
= control target key start
LH: loop header
LB: loop body
LE: loop exit
PB: predicated region body
PF: predicated region fallthrough
CT: control target
= control target key end

     0   :  { %s51_s0 = inlined_call_operand.hbm [shape: c64[2,4,4], index: 0, kind: input, shape index: {}]   ;;  %s52_s1 = inlined_call_operand.vmem [shape: f32[2,4,4], index: 1, kind: output, shape index: {}]  }
   0x1   :  { %s2_s8 = scalar_lea.hbm %s51_s0, 128 }
   0x2   :  { %3 = vsyncpa [#allocation0], 0  ;;  %s4_s11 = sshll.u32 %s52_s1, 4  ;;  %s5_s11 = int_to_ptr.vmem [resolvable:$true] %s4_s11 }
   0x3   :  { %s20_s12 = scalar_lea.vmem %s5_s11, 128  ;;  %p25_p1 = scmp.lt.s32.totalorder %s5_s11, %s5_s11 }
   0x4   :  { %p21_p0 = scmp.ne.s32.totalorder %s5_s11, %s20_s12  ;;  %p26_p2 = scmp.lt.s32.totalorder %s20_s12, %s20_s12 }
   0x6   :  { %p27_p3 = por %p26_p2, %p25_p1 }
   0x8   :  { %p28_p4 = pnand %p27_p3, %p21_p0 }
   0xa   :  { %31 = shalt.err (!%p28_p4)  }
   0xb   :  { %7 = dma.hbm_to_vmem [thread:$0]  %s2_s8, 128, %s5_s11, [#allocation0] }
   0xc   :  { %33 = dma.done.wait [#allocation0], 128  }
   0xd   :  { %34 = vsyncadd [#allocation0], 4294967168 }
   0xe   :  { %9 = vsyncpa [#allocation0], 1 }

// kernel: custom-call.4
= control target key start
LH: loop header
LB: loop body
LE: loop exit
PB: predicated region body
PF: predicated region fallthrough
CT: control target
= control target key end

     0   :  { %s92_s0 = inlined_call_operand.vmem [shape: f32[2,4,4], index: 0, kind: input, shape index: {}]   ;;  %s93_s1 = inlined_call_operand.vmem [shape: f32[2,4,4], index: 1, kind: input, shape index: {}]   ;;  %s94_s2 = inlined_call_operand.hbm [shape: c64[2,4,4], index: 2, kind: output, shape index: {}]  }
   0x1   :  { %s3_s11 = scalar_lea.hbm %s94_s2, 128 }
   0x2   :  { %4 = vsyncpa [#allocation0], 0  ;;  %s5_s14 = sshll.u32 %s92_s0, 4  ;;  %s6_s14 = int_to_ptr.vmem [resolvable:$true] %s5_s14 }
   0x3   :  { %s18_s15 = scalar_lea.vmem %s6_s14, 128  ;;  %p23_p1 = scmp.lt.s32.totalorder %s6_s14, %s6_s14 }
   0x4   :  { %p19_p0 = scmp.ne.s32.totalorder %s6_s14, %s18_s15  ;;  %p24_p2 = scmp.lt.s32.totalorder %s18_s15, %s18_s15 }
   0x6   :  { %p25_p3 = por %p24_p2, %p23_p1 }
   0x8   :  { %p26_p4 = pnand %p25_p3, %p19_p0 }
   0xa   :  { %29 = shalt.err (!%p26_p4)  }
   0xb   :  { %8 = dma.vmem_to_hbm [thread:$0]  %s6_s14, 128, %s94_s2, [#allocation0] }
   0xc   :  { %61 = dma.done.wait [#allocation0], 128  }
   0xd   :  { %62 = vsyncadd [#allocation0], 4294967168 }
   0xe   :  { %10 = vsyncpa [#allocation0], 1 }
   0xf   :  { %11 = vsyncpa [#allocation1], 0  ;;  %s12_s0 = sshll.u32 %s93_s1, 4  ;;  %s13_s0 = int_to_ptr.vmem [resolvable:$true] %s12_s0 }
  0x10   :  { %s38_s20 = scalar_lea.vmem %s13_s0, 128  ;;  %p43_p6 = scmp.lt.s32.totalorder %s13_s0, %s13_s0 }
  0x11   :  { %p39_p5 = scmp.ne.s32.totalorder %s13_s0, %s38_s20  ;;  %p44_p7 = scmp.lt.s32.totalorder %s38_s20, %s38_s20 }
  0x13   :  { %p45_p8 = por %p44_p7, %p43_p6 }
  0x15   :  { %p46_p9 = pnand %p45_p8, %p39_p5 }
  0x17   :  { %49 = shalt.err (!%p46_p9)  }
  0x18   :  { %15 = dma.vmem_to_hbm [thread:$0]  %s13_s0, 128, %s3_s11, [#allocation1] }
  0x19   :  { %63 = dma.done.wait [#allocation1], 128  }
  0x1a   :  { %64 = vsyncadd [#allocation1], 4294967168 }
  0x1b   :  { %17 = vsyncpa [#allocation1], 1 }

// kernel: policy_net_mimo_relay.1
= control target key start
LH: loop header
LB: loop body
LE: loop exit
PB: predicated region body
PF: predicated region fallthrough
CT: control target
= control target key end

     0   :  { %16 = vsyncpa [#allocation3], 0  ;;  %s3773_s0 = inlined_call_operand.vmem [shape: bf16[32,256], index: 0, kind: input, shape index: {}]   ;;  %s3774_s1 = inlined_call_operand.hbm [shape: f32[1,1664], index: 1, kind: input, shape index: {}]   ;;  %s3775_s2 = inlined_call_operand.vmem [shape: bf16[256,512], index: 2, kind: input, shape index: {}]   ;;  %s3776_s3 = inlined_call_operand.hbm [shape: bf16[512,256], index: 3, kind: input, shape index: {}]   ;;  %s3777_s4 = inlined_call_operand.vmem [shape: bf16[256,128], index: 4, kind: input, shape index: {}]   ;;  %s3778_s5 = inlined_call_operand.vmem [shape: bf16[128,64], index: 5, kind: input, shape index: {}]   ;;  %s3779_s6 = inlined_call_operand.vmem [shape: bf16[64,32], index: 6, kind: input, shape index: {}]   ;;  %s3780_s7 = inlined_call_operand.hbm [shape: bf16[32,32], index: 7, kind: input, shape index: {}]   ;;  %s3781_s8 = inlined_call_operand.hbm [shape: bf16[64,64], index: 8, kind: input, shape index: {}]   ;;  %s3782_s9 = inlined_call_operand.vmem [shape: bf16[128,64], index: 9, kind: input, shape index: {}]   ;;  %s3783_s10 = inlined_call_operand.hbm [shape: bf16[64,128], index: 10, kind: input, shape index: {}]   ;;  %s3784_s11 = inlined_call_operand.vmem [shape: f32[32,128], index: 11, kind: output, shape index: {}]  }
   0x1   :  { %17 = vsyncpa [#allocation5], 0 }
   0x2   :  { %18 = vsyncpa [#allocation8], 0  ;;  %s3282_s17 = smov 0  }
   0x3 LB: > { %s3209_s18 = smov [#allocation4]   ;;  %s2381_s20 = sadd.s32 4294967295, %s3207_s17   ;;  %s3207_s17 = sphi %s3282_s17, %s24_s17  }
   0x4   : > { %s317_s19 = sshll.u32 %s3209_s18, 4  ;;  %p2383_p0 = scmp.ge.s32.totalorder %s3207_s17, 1  ;;  %s318_s19 = int_to_ptr.vmem [resolvable:$true] %s317_s19 }
   0x5   : > { %p291_p1 = scmp.lt.s32.totalorder %s3207_s17, 3  ;;  %p3292_p2 = scmp.eq.s32.totalorder %s2381_s20, 0 }
   0x6   : > { %s3210_s24 = smov [#allocation7]   ;;  %s3211_s26 = smov [#allocation2]  }
   0x7   : > { %p3296_p3 = pnand %p2383_p0, %p291_p1  ;;  %s352_s25 = sshll.u32 %s3210_s24, 4  ;;  %s3308_s25 = int_to_ptr.vmem [resolvable:$true] %s352_s25 }
   0x8   : > { %s304_s27 = sshll.u32 %s3211_s26, 4  ;;  %s3070_s29 = scalar_lea.vmem %s318_s19, 8192  ;;  %s3310_s27 = int_to_ptr.vmem [resolvable:$true] %s304_s27 }
   0x9   : > { %p2753_p4 = pneg %p3296_p3  ;;  %p3071_p7 = scmp.ne.s32.totalorder %s318_s19, %s3070_s29 }
   0xa   : > { %p3078_p10 = scmp.lt.s32.totalorder %s318_s19, %s318_s19  ;;  %p3079_p11 = scmp.lt.s32.totalorder %s3070_s29, %s3070_s29 }
   0xb   : > { %p3304_p5 = pnand %p3292_p2, %p2753_p4 }
   0xc   : > { %p3080_p12 = por %p3079_p11, %p3078_p10 }
   0xd   : > { %p3314_p6 = pneg %p3304_p5 }
   0xf   : > { %p3073_p8 = pnand %p3071_p7, %p3314_p6 }
  0x11   : > { %p3074_p9 = pneg %p3073_p8 }
  0x13   : > { %p3081_p13 = pnand %p3080_p12, %p3074_p9 }
  0x15   : > { %3084 = shalt.err (!%p3081_p13)
}
  0x16   : > { %s3212_s30 = smov 128   ;;  %s3213_s12 = smov 8  }
  0x17   : > { %2759 = dma.hbm_to_vmem [thread:$0]  (!%p3304_p5), %s3776_s3, 8192, %s318_s19, [#allocation5], %s3212_s30, %s3212_s30, %s3213_s12  }
  0x18   : > { %s3096_s15 = scalar_lea.vmem %s3308_s25, 512  ;;  %p3104_p7 = scmp.lt.s32.totalorder %s3308_s25, %s3308_s25 }
  0x19   : > { %p3097_p0 = scmp.ne.s32.totalorder %s3308_s25, %s3096_s15  ;;  %p3105_p8 = scmp.lt.s32.totalorder %s3096_s15, %s3096_s15 }
  0x1b   : > { %p3099_p1 = pnand %p3097_p0, %p3314_p6  ;;  %p3106_p9 = por %p3105_p8, %p3104_p7 }
  0x1d   : > { %p3100_p4 = pneg %p3099_p1 }
  0x1f   : > { %p3107_p10 = pnand %p3106_p9, %p3100_p4 }
  0x21   : > { %3110 = shalt.err (!%p3107_p10)
}
  0x22   : > { %s3214_s16 = smov 64   ;;  %s3215_s18 = smov 4  }
  0x23   : > { %2765 = dma.hbm_to_vmem [thread:$0]  (!%p3304_p5), %s3781_s8, 512, %s3308_s25, [#allocation8], %s3214_s16, %s3214_s16, %s3215_s18  }
  0x24   : > { %s3122_s26 = scalar_lea.vmem %s3310_s27, 208  ;;  %s3129_s29 = scalar_lea.vmem %s3310_s27, 224 }
  0x25   : > { %p3123_p11 = scmp.ne.s32.totalorder %s3310_s27, %s3122_s26  ;;  %p3130_p0 = scmp.lt.s32.totalorder %s3310_s27, %s3310_s27 }
  0x26   : > { %p3131_p1 = scmp.lt.s32.totalorder %s3129_s29, %s3122_s26 }
  0x27   : > { %p3125_p12 = pnand %p3123_p11, %p3314_p6 }
  0x28   : > { %p3132_p4 = por %p3131_p1, %p3130_p0 }
  0x29   : > { %p3126_p13 = pneg %p3125_p12 }
  0x2b   : > { %p3133_p7 = pnand %p3132_p4, %p3126_p13 }
  0x2d   : > { %3136 = shalt.err (!%p3133_p7)
}
  0x2e   : > { %2756 = dma.hbm_to_vmem [thread:$0]  (!%p3304_p5), %s3774_s1, 208, %s3310_s27, [#allocation3]  }
  0x2f   : > { %s3216_s25 = smov [#allocation6]   ;;  %s3217_s14 = smov [#allocation9]  }
  0x30   : > { %s339_s13 = sshll.u32 %s3216_s25, 4  ;;  %s368_s15 = sshll.u32 %s3217_s14, 4  ;;  %s340_s13 = int_to_ptr.vmem [resolvable:$true] %s339_s13  ;;  %s369_s15 = int_to_ptr.vmem [resolvable:$true] %s368_s15 }
  0x31   : > { %s3148_s19 = scalar_lea.vmem %s340_s13, 256  ;;  %p3156_p11 = scmp.lt.s32.totalorder %s340_s13, %s340_s13 }
  0x32   : > { %p3149_p8 = scmp.ne.s32.totalorder %s340_s13, %s3148_s19  ;;  %p3157_p12 = scmp.lt.s32.totalorder %s3148_s19, %s3148_s19 }
  0x34   : > { %p3151_p9 = pnand %p3149_p8, %p3314_p6  ;;  %p3158_p13 = por %p3157_p12, %p3156_p11 }
  0x36   : > { %p3152_p10 = pneg %p3151_p9 }
  0x38   : > { %p3159_p0 = pnand %p3158_p13, %p3152_p10 }
  0x3a   : > { %3162 = shalt.err (!%p3159_p0)
}
  0x3b   : > { %2762 = dma.hbm_to_vmem [thread:$0]  (!%p3304_p5), %s3780_s7, 256, %s340_s13, [#allocation5], %s3214_s16, %s3214_s16, %s3215_s18  }
  0x3c   : > { %s3174_s26 = scalar_lea.vmem %s369_s15, 512  ;;  %p3182_p8 = scmp.lt.s32.totalorder %s369_s15, %s369_s15 }
  0x3d   : > { %p3175_p1 = scmp.ne.s32.totalorder %s369_s15, %s3174_s26  ;;  %p3183_p9 = scmp.lt.s32.totalorder %s3174_s26, %s3174_s26 }
  0x3f   : > { %p3177_p4 = pnand %p3175_p1, %p3314_p6  ;;  %p3184_p11 = por %p3183_p9, %p3182_p8 }
  0x41   : > { %p3178_p7 = pneg %p3177_p4 }
  0x43   : > { %p3185_p10 = pnand %p3184_p11, %p3178_p7 }
  0x45   : > { %3188 = shalt.err (!%p3185_p10)
}
  0x46   : > { %2768 = dma.hbm_to_vmem [thread:$0]  (!%p3304_p5), %s3783_s10, 512, %s369_s15, [#allocation8], %s3214_s16, %s3214_s16, %s3215_s18  }
  0x47   : > { %394 = sbr.rel (%p3296_p3) target bundleno = 2422 (0x976), region = 64 }
  0x4c   : > { %3194 = dma.done.wait (%p3292_p2), [#allocation3], 208  }
  0x4d   : > { %3196 = vsyncadd (%p3292_p2), [#allocation3], 4294967088 }
  0x4e   : > { %3198 = dma.done.wait (%p3292_p2), [#allocation5], 8448  }
  0x4f   : > { %3200 = vsyncadd (%p3292_p2), [#allocation5], 4294958848 }
  0x50   : > { %3202 = dma.done.wait (%p3292_p2), [#allocation8], 1024  }
  0x51   : > { %3204 = vsyncadd (%p3292_p2), [#allocation8], 4294966272  ;;  %v2810_v0 = vld [vmem:[%s3775_s2 + $0xe4] ss:$16 sps:$4 sm:$0xff]   ;;  %v2812_v1 = vld [vmem:[%s3775_s2 + $0xec] ss:$16 sps:$4 sm:$0xff]  }
  0x52   : > { %883 = vmatprep.subr.bf16.mxu0 %v2810_v0  ;;  %v2814_v2 = vld [vmem:[%s3775_s2 + $0xe0] ss:$16 sps:$4 sm:$0xff]   ;;  %v2815_v3 = vld [vmem:[%s3775_s2 + $0xe8] ss:$16 sps:$4 sm:$0xff]   ;;  %926 = vmatprep.subr.bf16.mxu1 %v2812_v1  ;;  %v2816_v4 = vld [vmem:[%s3775_s2 + $0xc4] ss:$16 sps:$4 sm:$0xff]  }
  0x53   : > { %884 = vmatpush1.bf16.msra.mxu0 %v2814_v2  ;;  %927 = vmatpush1.bf16.msra.mxu1 %v2815_v3  ;;  %v2818_v5 = vld [vmem:[%s3775_s2 + $0xcc] ss:$16 sps:$4 sm:$0xff]   ;;  %v2820_v6 = vld [vmem:[%s3775_s2 + $0xc0] ss:$16 sps:$4 sm:$0xff]   ;;  %v2821_v7 = vld [vmem:[%s3775_s2 + $0xc8] ss:$16 sps:$4 sm:$0xff]  }
  0x54   : > { %885 = vmatprep.subr.bf16.mxu0 %v2816_v4  ;;  %928 = vmatprep.subr.bf16.mxu1 %v2818_v5  ;;  %v2822_v8 = vld [vmem:[%s3775_s2 + $0xa4] ss:$16 sps:$4 sm:$0xff]   ;;  %v2824_v9 = vld [vmem:[%s3775_s2 + $0xac] ss:$16 sps:$4 sm:$0xff]   ;;  %v2826_v10 = vld [vmem:[%s3775_s2 + $0xa0] ss:$16 sps:$4 sm:$0xff]  }
  0x55   : > { %v2827_v11 = vld [vmem:[%s3775_s2 + $0xa8] ss:$16 sps:$4 sm:$0xff]   ;;  %v2828_v12 = vld [vmem:[%s3775_s2 + $0x84] ss:$16 sps:$4 sm:$0xff]   ;;  %v2830_v13 = vld [vmem:[%s3775_s2 + $0x8c] ss:$16 sps:$4 sm:$0xff]  }
  0x56   : > { %v2832_v14 = vld [vmem:[%s3775_s2 + $0x80] ss:$16 sps:$4 sm:$0xff]   ;;  %v2833_v15 = vld [vmem:[%s3775_s2 + $0x88] ss:$16 sps:$4 sm:$0xff]   ;;  %v2834_v16 = vld [vmem:[%s3775_s2 + $0x64] ss:$16 sps:$4 sm:$0xff]  }
  0x57   : > { %886 = vmatpush1.bf16.msra.mxu0 %v2820_v6  ;;  %929 = vmatpush1.bf16.msra.mxu1 %v2821_v7  ;;  %v2836_v17 = vld [vmem:[%s3775_s2 + $0x6c] ss:$16 sps:$4 sm:$0xff]   ;;  %v2838_v18 = vld [vmem:[%s3775_s2 + $0x60] ss:$16 sps:$4 sm:$0xff]   ;;  %v2839_v19 = vld [vmem:[%s3775_s2 + $0x68] ss:$16 sps:$4 sm:$0xff]  }
  0x58   : > { %887 = vmatprep.subr.bf16.mxu0 %v2822_v8  ;;  %930 = vmatprep.subr.bf16.mxu1 %v2824_v9  ;;  %v2840_v20 = vld [vmem:[%s3775_s2 + $0x44] ss:$16 sps:$4 sm:$0xff]   ;;  %v2842_v21 = vld [vmem:[%s3775_s2 + $0x4c] ss:$16 sps:$4 sm:$0xff]   ;;  %v2844_v22 = vld [vmem:[%s3775_s2 + $0x40] ss:$16 sps:$4 sm:$0xff]  }
  0x59   : > { %v2845_v23 = vld [vmem:[%s3775_s2 + $0x48] ss:$16 sps:$4 sm:$0xff]   ;;  %v2846_v24 = vld [vmem:[%s3775_s2 + $0x24] ss:$16 sps:$4 sm:$0xff]   ;;  %v2848_v25 = vld [vmem:[%s3775_s2 + $0x2c] ss:$16 sps:$4 sm:$0xff]  }
  0x5a   : > { %v2850_v26 = vld [vmem:[%s3775_s2 + $0x20] ss:$16 sps:$4 sm:$0xff]   ;;  %v2851_v27 = vld [vmem:[%s3775_s2 + $0x28] ss:$16 sps:$4 sm:$0xff]   ;;  %v2852_v28 = vld [vmem:[%s3775_s2 + $0x4] ss:$16 sps:$4 sm:$0xff]  }
  0x5b   : > { %888 = vmatpush1.bf16.msra.mxu0 %v2826_v10  ;;  %931 = vmatpush1.bf16.msra.mxu1 %v2827_v11  ;;  %v2854_v29 = vld [vmem:[%s3775_s2 + $0xc] ss:$16 sps:$4 sm:$0xff]   ;;  %s2396_s14 = sshll.u32 %s2381_s20, 1  ;;  %v2856_v30 = vld [vmem:[%s3775_s2] ss:$16 sps:$4 sm:$0xff]   ;;  %vm3219_vm0 = vmmov 0  }
  0x5c   : > { %889 = vmatprep.subr.bf16.mxu0 %v2828_v12  ;;  %932 = vmatprep.subr.bf16.mxu1 %v2830_v13  ;;  %v2857_v31 = vld [vmem:[%s3775_s2 + $0x8] ss:$16 sps:$4 sm:$0xff]   ;;  %v2858_v32 = vld [vmem:[%s3775_s2 + $0x1e4] ss:$16 sps:$4 sm:$0xff]   ;;  %v2860_v33 = vld [vmem:[%s3775_s2 + $0x1ec] ss:$16 sps:$4 sm:$0xff]  }
  0x5d   : > { %p452_p2 = scmp.lt.s32.totalorder %s2396_s14, 3  ;;  %v2862_v34 = vld [vmem:[%s3775_s2 + $0x1e0] ss:$16 sps:$4 sm:$0xff]   ;;  %v2863_v35 = vld [vmem:[%s3775_s2 + $0x1e8] ss:$16 sps:$4 sm:$0xff]   ;;  %vm1810_vm1 = vcmask 523264  }
  0x5e   : > { %v2864_v36 = vld [vmem:[%s3775_s2 + $0x1c4] ss:$16 sps:$4 sm:$0xff]   ;;  %v2866_v37 = vld [vmem:[%s3775_s2 + $0x1cc] ss:$16 sps:$4 sm:$0xff]   ;;  %v2868_v38 = vld [vmem:[%s3775_s2 + $0x1c0] ss:$16 sps:$4 sm:$0xff]  }
  0x5f   : > { %890 = vmatpush1.bf16.msra.mxu0 %v2832_v14  ;;  %933 = vmatpush1.bf16.msra.mxu1 %v2833_v15  ;;  %s3790_s14 = smov (!%p452_p2, %s2396_s14), 3  ;;  %v2869_v39 = vld [vmem:[%s3775_s2 + $0x1c8] ss:$16 sps:$4 sm:$0xff]   ;;  %v2870_v40 = vld [vmem:[%s3775_s2 + $0x1a4] ss:$16 sps:$4 sm:$0xff]   ;;  %vm1879_vm2 = vcmask 261120  }
  0x60   : > { %891 = vmatprep.subr.bf16.mxu0 %v2834_v16  ;;  %934 = vmatprep.subr.bf16.mxu1 %v2836_v17  ;;  %v2872_v41 = vld [vmem:[%s3775_s2 + $0x1ac] ss:$16 sps:$4 sm:$0xff]   ;;  %s2590_s22 = sshll.u32 %s3790_s14, 3  ;;  %v2874_v42 = vld [vmem:[%s3775_s2 + $0x1a0] ss:$16 sps:$4 sm:$0xff]   ;;  %s3220_s15 = smov 32  }
  0x61   : > { %v2875_v43 = vld [vmem:[%s3775_s2 + $0x1a8] ss:$16 sps:$4 sm:$0xff]   ;;  %v2876_v44 = vld [vmem:[%s3775_s2 + $0x184] ss:$16 sps:$4 sm:$0xff]   ;;  %s3532_s21 = scalar_lea.vmem %s3773_s0, %s2590_s22  ;;  %v2878_v45 = vld [vmem:[%s3775_s2 + $0x18c] ss:$16 sps:$4 sm:$0xff]   ;;  %s462_s26 = scalar_lea.vmem %s3784_s11, %s2590_s22 }
  0x62   : > { %v2880_v46 = vld [vmem:[%s3775_s2 + $0x180] ss:$16 sps:$4 sm:$0xff]   ;;  %v2881_v47 = vld [vmem:[%s3775_s2 + $0x188] ss:$16 sps:$4 sm:$0xff]   ;;  %v2908_v48 = vld [vmem:[%s3532_s21 + $0x4] ss:$8 sps:$4 sm:$0xff]  }
  0x63   : > { %892 = vmatpush1.bf16.msra.mxu0 %v2838_v18  ;;  %935 = vmatpush1.bf16.msra.mxu1 %v2839_v19  ;;  %v2882_v49 = vld [vmem:[%s3775_s2 + $0x164] ss:$16 sps:$4 sm:$0xff]   ;;  %v2884_v50 = vld [vmem:[%s3775_s2 + $0x16c] ss:$16 sps:$4 sm:$0xff]   ;;  %v2886_v51 = vld [vmem:[%s3775_s2 + $0x160] ss:$16 sps:$4 sm:$0xff]  }
  0x64   : > { %893 = vmatprep.subr.bf16.mxu0 %v2840_v20  ;;  %936 = vmatprep.subr.bf16.mxu1 %v2842_v21  ;;  %v2887_v52 = vld [vmem:[%s3775_s2 + $0x168] ss:$16 sps:$4 sm:$0xff]   ;;  %v2888_v53 = vld [vmem:[%s3775_s2 + $0x144] ss:$16 sps:$4 sm:$0xff]   ;;  %v2890_v54 = vld [vmem:[%s3775_s2 + $0x14c] ss:$16 sps:$4 sm:$0xff]  }
  0x65   : > { %915 = vmatprep.mubr.bf16.mxu0 %v2908_v48  ;;  %958 = vmatprep.mubr.bf16.mxu1 %v2908_v48  ;;  %v2892_v55 = vld [vmem:[%s3775_s2 + $0x140] ss:$16 sps:$4 sm:$0xff]   ;;  %v2893_v56 = vld [vmem:[%s3775_s2 + $0x148] ss:$16 sps:$4 sm:$0xff]   ;;  %v2894_v57 = vld [vmem:[%s3775_s2 + $0x124] ss:$16 sps:$4 sm:$0xff]  }
  0x66   : > { %v2896_v58 = vld [vmem:[%s3775_s2 + $0x12c] ss:$16 sps:$4 sm:$0xff]   ;;  %v2898_v59 = vld [vmem:[%s3775_s2 + $0x120] ss:$16 sps:$4 sm:$0xff]   ;;  %v2899_v60 = vld [vmem:[%s3775_s2 + $0x128] ss:$16 sps:$4 sm:$0xff]  }
  0x67   : > { %894 = vmatpush1.bf16.msra.mxu0 %v2844_v22  ;;  %937 = vmatpush1.bf16.msra.mxu1 %v2845_v23  ;;  %v2900_v61 = vld [vmem:[%s3775_s2 + $0x104] ss:$16 sps:$4 sm:$0xff]   ;;  %v2902_v62 = vld [vmem:[%s3775_s2 + $0x10c] ss:$16 sps:$4 sm:$0xff]   ;;  %v2904_v63 = vld [vmem:[%s3775_s2 + $0x100] ss:$16 sps:$4 sm:$0xff]  }
  0x68   : > { %895 = vmatprep.subr.bf16.mxu0 %v2846_v24  ;;  %938 = vmatprep.subr.bf16.mxu1 %v2848_v25  ;;  %v2905_v0 = vld [vmem:[%s3775_s2 + $0x108] ss:$16 sps:$4 sm:$0xff]   ;;  %s3221_s19 = smov 64  }
  0x69   : > { %v2911_v1 = vld [vmem:[#allocation4 + $0x74] ss:$8 sps:$4 sm:$0xff]   ;;  %v2909_v4 = vld [vmem:[#allocation4 + $0x70] ss:$8 sps:$4 sm:$0xff]   ;;  %v2917_v6 = vld [vmem:[#allocation4 + $0x64] ss:$8 sps:$4 sm:$0xff]  }
  0x6a   : > { %v2914_v2 = vld [vmem:[#allocation4 + $0x174] ss:$8 sps:$4 sm:$0xff]   ;;  %v2912_v5 = vld [vmem:[#allocation4 + $0x170] ss:$8 sps:$4 sm:$0xff]   ;;  %v2920_v7 = vld [vmem:[#allocation4 + $0x164] ss:$8 sps:$4 sm:$0xff]  }
  0x6b   : > { %896 = vmatpush1.bf16.msra.mxu0 %v2850_v26  ;;  %939 = vmatpush1.bf16.msra.mxu1 %v2851_v27  ;;  %v2906_v3 = vld [vmem:[%s3532_s21] ss:$8 sps:$4 sm:$0xff]   ;;  %v2915_v8 = vld [vmem:[#allocation4 + $0x60] ss:$8 sps:$4 sm:$0xff]   ;;  %v2929_v14 = vld [vmem:[#allocation4 + $0x44] ss:$8 sps:$4 sm:$0xff]  }
  0x6c   : > { %897 = vmatprep.subr.bf16.mxu0 %v2852_v28  ;;  %940 = vmatprep.subr.bf16.mxu1 %v2854_v29  ;;  %v2918_v9 = vld [vmem:[#allocation4 + $0x160] ss:$8 sps:$4 sm:$0xff]   ;;  %v2923_v10 = vld [vmem:[#allocation4 + $0x54] ss:$8 sps:$4 sm:$0xff]   ;;  %v2921_v12 = vld [vmem:[#allocation4 + $0x50] ss:$8 sps:$4 sm:$0xff]  }
  0x6d   : > { %v2926_v11 = vld [vmem:[#allocation4 + $0x154] ss:$8 sps:$4 sm:$0xff]   ;;  %v2924_v13 = vld [vmem:[#allocation4 + $0x150] ss:$8 sps:$4 sm:$0xff]   ;;  %v2932_v15 = vld [vmem:[#allocation4 + $0x144] ss:$8 sps:$4 sm:$0xff]  }
  0x6e   : > { %v2927_v16 = vld [vmem:[#allocation4 + $0x40] ss:$8 sps:$4 sm:$0xff]   ;;  %v2935_v18 = vld [vmem:[#allocation4 + $0x34] ss:$8 sps:$4 sm:$0xff]   ;;  %v2933_v20 = vld [vmem:[#allocation4 + $0x30] ss:$8 sps:$4 sm:$0xff]  }
  0x6f   : > { %898 = vmatpush1.bf16.msra.mxu0 %v2856_v30  ;;  %941 = vmatpush1.bf16.msra.mxu1 %v2857_v31  ;;  %v2930_v17 = vld [vmem:[#allocation4 + $0x140] ss:$8 sps:$4 sm:$0xff]   ;;  %v2938_v19 = vld [vmem:[#allocation4 + $0x134] ss:$8 sps:$4 sm:$0xff]   ;;  %v2936_v21 = vld [vmem:[#allocation4 + $0x130] ss:$8 sps:$4 sm:$0xff]  }
  0x70   : > { %899 = vmatprep.subr.bf16.mxu0 %v2858_v32  ;;  %942 = vmatprep.subr.bf16.mxu1 %v2860_v33  ;;  %v2941_v22 = vld [vmem:[#allocation4 + $0x24] ss:$8 sps:$4 sm:$0xff]   ;;  %v2939_v24 = vld [vmem:[#allocation4 + $0x20] ss:$8 sps:$4 sm:$0xff]   ;;  %v2947_v26 = vld [vmem:[#allocation4 + $0x14] ss:$8 sps:$4 sm:$0xff]  }
  0x71   : > { %v2944_v23 = vld [vmem:[#allocation4 + $0x124] ss:$8 sps:$4 sm:$0xff]   ;;  %v2942_v25 = vld [vmem:[#allocation4 + $0x120] ss:$8 sps:$4 sm:$0xff]   ;;  %v2950_v27 = vld [vmem:[#allocation4 + $0x114] ss:$8 sps:$4 sm:$0xff]  }
  0x72   : > { %v2945_v28 = vld [vmem:[#allocation4 + $0x10] ss:$8 sps:$4 sm:$0xff]   ;;  %v2953_v30 = vld [vmem:[#allocation4 + $0x4] ss:$8 sps:$4 sm:$0xff]   ;;  %v2951_v32 = vld [vmem:[#allocation4] ss:$8 sps:$4 sm:$0xff]  }
  0x73   : > { %900 = vmatpush2.bf16.msra.mxu0 %v2862_v34  ;;  %943 = vmatpush2.bf16.msra.mxu1 %v2863_v35  ;;  %v2948_v29 = vld [vmem:[#allocation4 + $0x110] ss:$8 sps:$4 sm:$0xff]   ;;  %v2956_v31 = vld [vmem:[#allocation4 + $0x104] ss:$8 sps:$4 sm:$0xff]   ;;  %v2954_v33 = vld [vmem:[#allocation4 + $0x100] ss:$8 sps:$4 sm:$0xff]  }
  0x74   : > { %901 = vmatprep.subr.bf16.mxu0 %v2864_v36  ;;  %944 = vmatprep.subr.bf16.mxu1 %v2866_v37  ;;  %v2959_v34 = vld [vmem:[#allocation4 + $0xf4] ss:$8 sps:$4 sm:$0xff]   ;;  %v2957_v36 = vld [vmem:[#allocation4 + $0xf0] ss:$8 sps:$4 sm:$0xff]   ;;  %v2975_v48 = vld [vmem:[#allocation4 + $0xc0] ss:$8 sps:$4 sm:$0xff]  }
  0x75   : > { %v2962_v35 = vld [vmem:[#allocation4 + $0x1f4] ss:$8 sps:$4 sm:$0xff]   ;;  %v2960_v37 = vld [vmem:[#allocation4 + $0x1f0] ss:$8 sps:$4 sm:$0xff]  }
  0x77   : > { %902 = vmatpush2.bf16.msra.mxu0 %v2868_v38  ;;  %945 = vmatpush2.bf16.msra.mxu1 %v2869_v39  ;;  %v2965_v38 = vld [vmem:[#allocation4 + $0xe4] ss:$8 sps:$4 sm:$0xff]  }
  0x78   : > { %903 = vmatprep.subr.bf16.mxu0 %v2870_v40  ;;  %946 = vmatprep.subr.bf16.mxu1 %v2872_v41  ;;  %v2968_v39 = vld [vmem:[#allocation4 + $0x1e4] ss:$8 sps:$4 sm:$0xff]   ;;  %v2963_v40 = vld [vmem:[#allocation4 + $0xe0] ss:$8 sps:$4 sm:$0xff]  }
  0x79   : > { %v2966_v41 = vld [vmem:[#allocation4 + $0x1e0] ss:$8 sps:$4 sm:$0xff]  }
  0x7b   : > { %904 = vmatpush2.bf16.msra.mxu0 %v2874_v42  ;;  %947 = vmatpush2.bf16.msra.mxu1 %v2875_v43  ;;  %v2971_v42 = vld [vmem:[#allocation4 + $0xd4] ss:$8 sps:$4 sm:$0xff]  }
  0x7c   : > { %905 = vmatprep.subr.bf16.mxu0 %v2876_v44  ;;  %948 = vmatprep.subr.bf16.mxu1 %v2878_v45  ;;  %v2974_v43 = vld [vmem:[#allocation4 + $0x1d4] ss:$8 sps:$4 sm:$0xff]   ;;  %v2969_v44 = vld [vmem:[#allocation4 + $0xd0] ss:$8 sps:$4 sm:$0xff]  }
  0x7d   : > { %v2972_v45 = vld [vmem:[#allocation4 + $0x1d0] ss:$8 sps:$4 sm:$0xff]  }
  0x7f   : > { %906 = vmatpush2.bf16.msra.mxu0 %v2880_v46  ;;  %949 = vmatpush2.bf16.msra.mxu1 %v2881_v47  ;;  %v2977_v46 = vld [vmem:[#allocation4 + $0xc4] ss:$8 sps:$4 sm:$0xff]  }
  0x80   : > { %907 = vmatprep.subr.bf16.mxu0 %v2882_v49  ;;  %950 = vmatprep.subr.bf16.mxu1 %v2884_v50  ;;  %v2980_v47 = vld [vmem:[#allocation4 + $0x1c4] ss:$8 sps:$4 sm:$0xff]   ;;  %v2978_v49 = vld [vmem:[#allocation4 + $0x1c0] ss:$8 sps:$4 sm:$0xff]   ;;  %v2983_v50 = vld [vmem:[#allocation4 + $0xb4] ss:$8 sps:$4 sm:$0xff]  }
  0x83   : > { %908 = vmatpush2.bf16.msra.mxu0 %v2886_v51  ;;  %951 = vmatpush2.bf16.msra.mxu1 %v2887_v52  ;;  %v2986_v51 = vld [vmem:[#allocation4 + $0x1b4] ss:$8 sps:$4 sm:$0xff]   ;;  %v2981_v52 = vld [vmem:[#allocation4 + $0xb0] ss:$8 sps:$4 sm:$0xff]  }
  0x84   : > { %909 = vmatprep.subr.bf16.mxu0 %v2888_v53  ;;  %952 = vmatprep.subr.bf16.mxu1 %v2890_v54  ;;  %v2984_v53 = vld [vmem:[#allocation4 + $0x1b0] ss:$8 sps:$4 sm:$0xff]   ;;  %v2989_v54 = vld [vmem:[#allocation4 + $0xa4] ss:$8 sps:$4 sm:$0xff]  }
  0x87   : > { %910 = vmatpush2.bf16.msra.mxu0 %v2892_v55  ;;  %953 = vmatpush2.bf16.msra.mxu1 %v2893_v56  ;;  %v2992_v55 = vld [vmem:[#allocation4 + $0x1a4] ss:$8 sps:$4 sm:$0xff]   ;;  %v2987_v56 = vld [vmem:[#allocation4 + $0xa0] ss:$8 sps:$4 sm:$0xff]  }
  0x88   : > { %911 = vmatprep.subr.bf16.mxu0 %v2894_v57  ;;  %954 = vmatprep.subr.bf16.mxu1 %v2896_v58  ;;  %v2990_v57 = vld [vmem:[#allocation4 + $0x1a0] ss:$8 sps:$4 sm:$0xff]   ;;  %v2995_v58 = vld [vmem:[#allocation4 + $0x94] ss:$8 sps:$4 sm:$0xff]  }
  0x8b   : > { %912 = vmatpush2.bf16.msra.mxu0 %v2898_v59  ;;  %955 = vmatpush2.bf16.msra.mxu1 %v2899_v60  ;;  %v2998_v59 = vld [vmem:[#allocation4 + $0x194] ss:$8 sps:$4 sm:$0xff]   ;;  %v2993_v60 = vld [vmem:[#allocation4 + $0x90] ss:$8 sps:$4 sm:$0xff]  }
  0x8c   : > { %913 = vmatprep.subr.bf16.mxu0 %v2900_v61  ;;  %956 = vmatprep.subr.bf16.mxu1 %v2902_v62  ;;  %v2996_v61 = vld [vmem:[#allocation4 + $0x190] ss:$8 sps:$4 sm:$0xff]   ;;  %v3001_v62 = vld [vmem:[#allocation4 + $0x84] ss:$8 sps:$4 sm:$0xff]  }
  0x8f   : > { %914 = vmatpush2.bf16.msra.mxu0 %v2904_v63  ;;  %957 = vmatpush2.bf16.msra.mxu1 %v2905_v0  ;;  %v3004_v63 = vld [vmem:[#allocation4 + $0x184] ss:$8 sps:$4 sm:$0xff]   ;;  %v2999_v0 = vld [vmem:[#allocation4 + $0x80] ss:$8 sps:$4 sm:$0xff]  }
  0x90   : > { %1385 = vmatprep.subr.bf16.mxu0 %v2911_v1  ;;  %1428 = vmatprep.subr.bf16.mxu1 %v2914_v2  ;;  %v3002_v1 = vld [vmem:[#allocation4 + $0x180] ss:$8 sps:$4 sm:$0xff]  }
  0x91   : > { %v3005_v2 = vld [vmem:[%s3777_s4 + $0x78] sm:$0xff]  }
  0x92   : > { %916 = vmatmul.mubr.bf16.vlgmr.msra.gmra.mxu0 %v2906_v3  ;;  %959 = vmatmul.mubr.bf16.vlgmr.msra.gmra.mxu1 %v2906_v3  ;;  %v533_v3 = vlaneseq }
  0x93   : > { %1386 = vmatpush1.bf16.msra.mxu0 %v2909_v4  ;;  %1429 = vmatpush1.bf16.msra.mxu1 %v2912_v5 }
  0x94   : > { %1387 = vmatprep.subr.bf16.mxu0 %v2917_v6  ;;  %1430 = vmatprep.subr.bf16.mxu1 %v2920_v7  ;;  %v3596_v4 = vshrl.u32 %v533_v3, 7  ;;  %v531_v6 = vld [vmem:[#allocation2] sm:$0xf]  ;;  %v3022_v3 = vld [vmem:[%s3778_s5 + $0x30] sm:$0xff]  }
  0x96   : > { %v535_v5 = vsub.s32 0, %v3596_v4  ;;  %v539_v7 = vsub.s32 1, %v3596_v4 }
  0x97   : > { %1388 = vmatpush1.bf16.msra.mxu0 %v2915_v8  ;;  %1431 = vmatpush1.bf16.msra.mxu1 %v2918_v9  ;;  %v547_v8 = vsub.s32 3, %v3596_v4  ;;  %v543_v9 = vsub.s32 2, %v3596_v4 }
  0x98   : > { %1389 = vmatprep.subr.bf16.mxu0 %v2923_v10  ;;  %1432 = vmatprep.subr.bf16.mxu1 %v2926_v11  ;;  %v536_v10 = vrot.slane %v531_v6, %v535_v5  ;;  %v540_v11 = vrot.slane %v531_v6, %v539_v7 }
  0x9b   : > { %1390 = vmatpush1.bf16.msra.mxu0 %v2921_v12  ;;  %1433 = vmatpush1.bf16.msra.mxu1 %v2924_v13  ;;  %v548_v12 = vrot.slane %v531_v6, %v547_v8  ;;  %v3024_v8 = vld [vmem:[%s3778_s5 + $0x20] sm:$0xff]  }
  0x9c   : > { %1391 = vmatprep.subr.bf16.mxu0 %v2929_v14  ;;  %1434 = vmatprep.subr.bf16.mxu1 %v2932_v15  ;;  %v544_v14 = vrot.slane %v531_v6, %v543_v9  ;;  %v3023_v6 = vld [vmem:[%s3778_s5 + $0x28] sm:$0xff]   ;;  %v1053_v9 = vld [vmem:[#allocation2 + $0x4] sm:$0x3] }
  0x9f   : > { %1392 = vmatpush1.bf16.msra.mxu0 %v2927_v16  ;;  %1435 = vmatpush1.bf16.msra.mxu1 %v2930_v17 }
  0xa0   : > { %1393 = vmatprep.subr.bf16.mxu0 %v2935_v18  ;;  %1436 = vmatprep.subr.bf16.mxu1 %v2938_v19 }
  0xa3   : > { %1394 = vmatpush1.bf16.msra.mxu0 %v2933_v20  ;;  %1437 = vmatpush1.bf16.msra.mxu1 %v2936_v21 }
  0xa4   : > { %1395 = vmatprep.subr.bf16.mxu0 %v2941_v22  ;;  %1438 = vmatprep.subr.bf16.mxu1 %v2944_v23 }
  0xa7   : > { %1396 = vmatpush1.bf16.msra.mxu0 %v2939_v24  ;;  %1439 = vmatpush1.bf16.msra.mxu1 %v2942_v25 }
  0xa8   : > { %1397 = vmatprep.subr.bf16.mxu0 %v2947_v26  ;;  %1440 = vmatprep.subr.bf16.mxu1 %v2950_v27 }
  0xab   : > { %1398 = vmatpush1.bf16.msra.mxu0 %v2945_v28  ;;  %1441 = vmatpush1.bf16.msra.mxu1 %v2948_v29 }
  0xac   : > { %1399 = vmatprep.subr.bf16.mxu0 %v2953_v30  ;;  %1442 = vmatprep.subr.bf16.mxu1 %v2956_v31 }
  0xaf   : > { %1400 = vmatpush1.bf16.msra.mxu0 %v2951_v32  ;;  %1443 = vmatpush1.bf16.msra.mxu1 %v2954_v33 }
  0xb0   : > { %1401 = vmatprep.subr.bf16.mxu0 %v2959_v34  ;;  %1444 = vmatprep.subr.bf16.mxu1 %v2962_v35 }
  0xb3   : > { %1402 = vmatpush2.bf16.msra.mxu0 %v2957_v36  ;;  %1445 = vmatpush2.bf16.msra.mxu1 %v2960_v37 }
  0xb4   : > { %1403 = vmatprep.subr.bf16.mxu0 %v2965_v38  ;;  %1446 = vmatprep.subr.bf16.mxu1 %v2968_v39 }
  0xb7   : > { %1404 = vmatpush2.bf16.msra.mxu0 %v2963_v40  ;;  %1447 = vmatpush2.bf16.msra.mxu1 %v2966_v41 }
  0xb8   : > { %1405 = vmatprep.subr.bf16.mxu0 %v2971_v42  ;;  %1448 = vmatprep.subr.bf16.mxu1 %v2974_v43 }
  0xbb   : > { %1406 = vmatpush2.bf16.msra.mxu0 %v2969_v44  ;;  %1449 = vmatpush2.bf16.msra.mxu1 %v2972_v45 }
  0xbc   : > { %1407 = vmatprep.subr.bf16.mxu0 %v2977_v46  ;;  %1450 = vmatprep.subr.bf16.mxu1 %v2980_v47 }
  0xbf   : > { %1408 = vmatpush2.bf16.msra.mxu0 %v2975_v48  ;;  %1451 = vmatpush2.bf16.msra.mxu1 %v2978_v49  ;;  %v3006_v48 = vld [vmem:[%s3777_s4 + $0x38] sm:$0xff]  }
  0xc0   : > { %1409 = vmatprep.subr.bf16.mxu0 %v2983_v50  ;;  %1452 = vmatprep.subr.bf16.mxu1 %v2986_v51  ;;  %v3007_v51 = vld [vmem:[%s3777_s4 + $0x70] sm:$0xff]  }
  0xc3   : > { %1410 = vmatpush2.bf16.msra.mxu0 %v2981_v52  ;;  %1453 = vmatpush2.bf16.msra.mxu1 %v2984_v53  ;;  %v3008_v52 = vld [vmem:[%s3777_s4 + $0x30] sm:$0xff]   ;;  %v3009_v53 = vld [vmem:[%s3777_s4 + $0x68] sm:$0xff]  }
  0xc4   : > { %1411 = vmatprep.subr.bf16.mxu0 %v2989_v54  ;;  %1454 = vmatprep.subr.bf16.mxu1 %v2992_v55  ;;  %v3010_v54 = vld [vmem:[%s3777_s4 + $0x28] sm:$0xff]   ;;  %v3011_v55 = vld [vmem:[%s3777_s4 + $0x60] sm:$0xff]  }
  0xc7   : > { %1412 = vmatpush2.bf16.msra.mxu0 %v2987_v56  ;;  %1455 = vmatpush2.bf16.msra.mxu1 %v2990_v57  ;;  %v3012_v56 = vld [vmem:[%s3777_s4 + $0x20] sm:$0xff]   ;;  %v3013_v57 = vld [vmem:[%s3777_s4 + $0x58] sm:$0xff]  }
  0xc8   : > { %1413 = vmatprep.subr.bf16.mxu0 %v2995_v58  ;;  %1456 = vmatprep.subr.bf16.mxu1 %v2998_v59  ;;  %v3014_v58 = vld [vmem:[%s3777_s4 + $0x18] sm:$0xff]   ;;  %v3015_v59 = vld [vmem:[%s3777_s4 + $0x50] sm:$0xff]  }
  0xcb   : > { %1414 = vmatpush2.bf16.msra.mxu0 %v2993_v60  ;;  %1457 = vmatpush2.bf16.msra.mxu1 %v2996_v61  ;;  %v3016_v60 = vld [vmem:[%s3777_s4 + $0x10] sm:$0xff]   ;;  %v3017_v61 = vld [vmem:[%s3777_s4 + $0x48] sm:$0xff]  }
  0xcc   : > { %1415 = vmatprep.subr.bf16.mxu0 %v3001_v62  ;;  %1458 = vmatprep.subr.bf16.mxu1 %v3004_v63  ;;  %v3018_v62 = vld [vmem:[%s3777_s4 + $0x8] sm:$0xff]   ;;  %v3019_v63 = vld [vmem:[%s3777_s4 + $0x40] sm:$0xff]  }
  0xcf   : > { %1416 = vmatpush2.bf16.msra.mxu0 %v2999_v0  ;;  %1459 = vmatpush2.bf16.msra.mxu1 %v3002_v1  ;;  %v3020_v0 = vld [vmem:[%s3777_s4] sm:$0xff]   ;;  %v3021_v1 = vld [vmem:[%s3778_s5 + $0x38] sm:$0xff]  }
  0xd0   : > { %2591 = vmatprep.subr.bf16.mxu0 %v3005_v2  ;;  %v3218_v2 = vmov 0.0  }
  0xd1   : > { %2649 = vmatprep.subr.bf16.mxu1 %v3218_v2 }
 0x152   : > { %v917_v13 = vpop.f32.mrf.mxu0  ;;  %v960_v15 = vpop.f32.mrf.mxu1 }
 0x153   : > { %v918_v16 = vadd.f32 %v917_v13, %v536_v10  ;;  %v961_v21 = vadd.f32 %v960_v15, %v544_v14 }
 0x154   : > { %v919_v17 = vpop.f32.mrf.mxu0  ;;  %v962_v18 = vpop.f32.mrf.mxu1 }
 0x155   : > { %v920_v19 = vadd.f32 %v919_v17, %v540_v11  ;;  %v963_v20 = vadd.f32 %v962_v18, %v548_v12  ;;  %v969_v24 = vmul.f32 0.01, %v918_v16  ;;  %v971_v33 = vmul.f32 0.01, %v961_v21 }
 0x156   : > { %v921_v22 = vpop.f32.mrf.mxu0  ;;  %v964_v23 = vpop.f32.mrf.mxu1 }
 0x157   : > { %v922_v25 = vadd.f32 %v921_v22, %v536_v10  ;;  %v965_v26 = vadd.f32 %v964_v23, %v544_v14  ;;  %v970_v29 = vmul.f32 0.01, %v920_v19  ;;  %v972_v30 = vmul.f32 0.01, %v963_v20 }
 0x158   : > { %v923_v27 = vpop.f32.mrf.mxu0  ;;  %v966_v28 = vpop.f32.mrf.mxu1  ;;  %v977_v44 = vmax.f32 %v918_v16, %v969_v24  ;;  %v979_v45 = vmax.f32 %v961_v21, %v971_v33  ;;  %v1062_v10 = vrot.slane %v1053_v9, %v539_v7  ;;  %v3027_v33 = vld [vmem:[%s3778_s5 + $0x8] sm:$0xff]  }
 0x159   : > { %v924_v31 = vadd.f32 %v923_v27, %v540_v11  ;;  %v967_v32 = vadd.f32 %v966_v28, %v548_v12  ;;  %v973_v34 = vmul.f32 0.01, %v922_v25  ;;  %v975_v35 = vmul.f32 0.01, %v965_v26 }
 0x15a   : > { %v978_v40 = vmax.f32 %v920_v19, %v970_v29  ;;  %v980_v41 = vmax.f32 %v963_v20, %v972_v30  ;;  %v1058_v11 = vrot.slane %v1053_v9, %v535_v5 }
 0x15b   : > { %v974_v36 = vmul.f32 0.01, %v924_v31  ;;  %v976_v37 = vmul.f32 0.01, %v967_v32  ;;  %v981_v38 = vmax.f32 %v922_v25, %v973_v34  ;;  %v983_v39 = vmax.f32 %v965_v26, %v975_v35  ;;  %v3028_v34 = vld [vmem:[%s3778_s5] sm:$0xff]   ;;  %v3029_v35 = vld [vmem:[%s3779_s6 + $0x18] sm:$0xff]  }
 0x15d   : > { %v982_v42 = vmax.f32 %v924_v31, %v974_v36  ;;  %v984_v43 = vmax.f32 %v967_v32, %v976_v37  ;;  %v985_v49 = vpack.c.bf16 %v981_v38, %v977_v44  ;;  %v987_v50 = vpack.c.bf16 %v983_v39, %v979_v45  ;;  %v3025_v31 = vld [vmem:[%s3778_s5 + $0x18] sm:$0xff]   ;;  %v3026_v32 = vld [vmem:[%s3778_s5 + $0x10] sm:$0xff]   ;;  %v2531_v39 = vld [vmem:[#allocation2 + $0x6] ss:$0 sm:$0xff] }
 0x15f   : > { %v986_v46 = vpack.c.bf16 %v982_v42, %v978_v40  ;;  %v988_v47 = vpack.c.bf16 %v984_v43, %v980_v41 }
 0x161   : > { %1417 = vmatprep.mubr.bf16.mxu0 %v986_v46  ;;  %1460 = vmatprep.mubr.bf16.mxu1 %v988_v47 }
 0x162   : > { %1418 = vmatmul.mubr.bf16.vlgmr.msra.gmra.mxu0 %v985_v49  ;;  %1461 = vmatmul.mubr.bf16.vlgmr.msra.gmra.mxu1 %v987_v50  ;;  %v3031_v49 = vld [vmem:[%s3779_s6 + $0x8] sm:$0xff]   ;;  %v3032_v50 = vld [vmem:[%s3779_s6] sm:$0xff]  }
 0x163   : > { %2592 = vmatpush3.bf16.msra.mxu0 %v3006_v48  ;;  %2650 = vmatpush3.bf16.msra.mxu1 %v3021_v1  ;;  %v3030_v48 = vld [vmem:[%s3779_s6 + $0x10] sm:$0xff]  }
 0x164   : > { %2593 = vmatprep.subr.bf16.mxu0 %v3007_v51  ;;  %2651 = vmatprep.subr.bf16.mxu1 %v3218_v2  ;;  %v2548_v51 = vld [vmem:[#allocation2 + $0x7] ss:$0 sm:$0xff] }
 0x165   : > { %2665 = vmatprep.mubr.msk.bf16.mxu1 %vm3219_vm0, %v3218_v2 }
 0x167   : > { %2594 = vmatpush3.bf16.msra.mxu0 %v3008_v52  ;;  %2652 = vmatpush3.bf16.msra.mxu1 %v3022_v3 }
 0x168   : > { %2595 = vmatprep.subr.bf16.mxu0 %v3009_v53  ;;  %2653 = vmatprep.subr.bf16.mxu1 %v3218_v2 }
 0x16b   : > { %2596 = vmatpush3.bf16.msra.mxu0 %v3010_v54  ;;  %2654 = vmatpush3.bf16.msra.mxu1 %v3023_v6 }
 0x16c   : > { %2597 = vmatprep.subr.bf16.mxu0 %v3011_v55  ;;  %2655 = vmatprep.subr.bf16.mxu1 %v3218_v2 }
 0x16f   : > { %2598 = vmatpush3.bf16.msra.mxu0 %v3012_v56  ;;  %2656 = vmatpush3.bf16.msra.mxu1 %v3024_v8 }
 0x170   : > { %2599 = vmatprep.subr.bf16.mxu0 %v3013_v57  ;;  %2657 = vmatprep.subr.bf16.mxu1 %v3218_v2 }
 0x173   : > { %2600 = vmatpush3.bf16.msra.mxu0 %v3014_v58  ;;  %2658 = vmatpush3.bf16.msra.mxu1 %v3025_v31 }
 0x174   : > { %2601 = vmatprep.subr.bf16.mxu0 %v3015_v59  ;;  %2659 = vmatprep.subr.bf16.mxu1 %v3218_v2 }
 0x177   : > { %2602 = vmatpush3.bf16.msra.mxu0 %v3016_v60  ;;  %2660 = vmatpush3.bf16.msra.mxu1 %v3026_v32 }
 0x178   : > { %2603 = vmatprep.subr.bf16.mxu0 %v3017_v61  ;;  %2661 = vmatprep.subr.bf16.mxu1 %v3218_v2  ;;  %v3033_v61 = vld [vmem:[#allocation6 + $0x8] sm:$0xff]  }
 0x17b   : > { %2604 = vmatpush3.bf16.msra.mxu0 %v3018_v62  ;;  %2662 = vmatpush3.bf16.msra.mxu1 %v3027_v33  ;;  %v3034_v62 = vld [vmem:[#allocation6] sm:$0xff]  }
 0x17c   : > { %2605 = vmatprep.subr.bf16.mxu0 %v3019_v63  ;;  %2663 = vmatprep.subr.bf16.mxu1 %v3218_v2 }
 0x17f   : > { %2606 = vmatpush3.bf16.msra.mxu0 %v3020_v0  ;;  %2664 = vmatpush3.bf16.msra.mxu1 %v3028_v34  ;;  %v2557_v0 = vld [vmem:[#allocation2 + $0x8] ss:$0 sm:$0xff] }
 0x180   : > { %2669 = vmatprep.subr.bf16.mxu0 %v3218_v2  ;;  %2681 = vmatprep.subr.bf16.mxu1 %v3218_v2 }
 0x222   : > { %v1419_v12 = vpop.f32.mrf.mxu0  ;;  %v1462_v13 = vpop.f32.mrf.mxu1 }
 0x223   : > { %v1420_v17 = vadd.f32 %v1419_v12, %v1058_v11  ;;  %v3036_v12 = vld [vmem:[#allocation7 + $0x10] sm:$0xff]  }
 0x224   : > { %v1421_v14 = vpop.f32.mrf.mxu0  ;;  %v1464_v15 = vpop.f32.mrf.mxu1 }
 0x225   : > { %v1422_v16 = vadd.f32 %v1421_v14, %v1062_v10  ;;  %v1463_v25 = vadd.f32 %v1462_v13, %v1420_v17  ;;  %v3037_v13 = vld [vmem:[#allocation7 + $0x8] sm:$0xff]  }
 0x226   : > { %v1423_v18 = vpop.f32.mrf.mxu0  ;;  %v1466_v19 = vpop.f32.mrf.mxu1  ;;  %v2563_v14 = vld [vmem:[#allocation2 + $0x9] ss:$0 sm:$0xff] }
 0x227   : > { %v1424_v20 = vadd.f32 %v1423_v18, %v1058_v11  ;;  %v1465_v22 = vadd.f32 %v1464_v15, %v1422_v16  ;;  %v1471_v5 = vmax.f32 %v1463_v25, 0.0  ;;  %v3035_v11 = vld [vmem:[#allocation7 + $0x18] sm:$0xff]   ;;  %v3038_v25 = vld [vmem:[#allocation7] sm:$0xff]  }
 0x228   : > { %v1425_v21 = vpop.f32.mrf.mxu0  ;;  %v1468_v26 = vpop.f32.mrf.mxu1 }
 0x229   : > { %v1467_v23 = vadd.f32 %v1466_v19, %v1424_v20  ;;  %v1426_v24 = vadd.f32 %v1425_v21, %v1062_v10  ;;  %v1472_v28 = vmax.f32 %v1465_v22, 0.0 }
 0x22b   : > { %v1469_v27 = vadd.f32 %v1468_v26, %v1426_v24  ;;  %v1473_v7 = vmax.f32 %v1467_v23, 0.0 }
 0x22d   : > { %v1474_v4 = vmax.f32 %v1469_v27, 0.0  ;;  %v1475_v30 = vpack.c.bf16 %v1473_v7, %v1471_v5 }
 0x22f   : > { %v1476_v29 = vpack.c.bf16 %v1474_v4, %v1472_v28 }
 0x231   : > { %1644 = vmatprep.mubr.bf16.mxu0 %v1476_v29 }
 0x232   : > { %1645 = vmatmul.mubr.bf16.vlgmr.msra.gmra.mxu0 %v1475_v30 }
 0x233   : > { %2677 = vmatprep.mubr.msk.bf16.mxu0 %vm3219_vm0, %v3218_v2  ;;  %2670 = vmatpush3.bf16.msra.mxu0 %v3029_v35 }
 0x234   : > { %2671 = vmatprep.subr.bf16.mxu0 %v3218_v2 }
 0x237   : > { %2672 = vmatpush3.bf16.msra.mxu0 %v3030_v48 }
 0x238   : > { %2673 = vmatprep.subr.bf16.mxu0 %v3218_v2 }
 0x23b   : > { %2674 = vmatpush3.bf16.msra.mxu0 %v3031_v49 }
 0x23c   : > { %2675 = vmatprep.subr.bf16.mxu0 %v3218_v2 }
 0x23f   : > { %2676 = vmatpush3.bf16.msra.mxu0 %v3032_v50  ;;  %v3045_v50 = vld [vmem:[%s3782_s9 + $0x8] sm:$0xff]  }
 0x240   : > { %2701 = vmatprep.subr.bf16.mxu0 %v3218_v2 }
 0x2f2   : > { %v2607_v36 = vpop.f32.mrf.mxu0 }
 0x2f4   : > { %v2608_v37 = vpop.f32.mrf.mxu0 }
 0x2f5   : > { %v2609_v38 = vadd.f32 %v2608_v37, %v2607_v36  ;;  %v3039_v36 = vld [vmem:[%s3782_s9 + $0x38] sm:$0xff]   ;;  %v3040_v37 = vld [vmem:[%s3782_s9 + $0x30] sm:$0xff]  }
 0x2f6   : > { %v2610_v40 = vpop.f32.mrf.mxu0 }
 0x2f7   : > { %v1647_v42 = vadd.f32 %v2609_v38, %v2531_v39  ;;  %v3041_v38 = vld [vmem:[%s3782_s9 + $0x28] sm:$0xff]  }
 0x2f8   : > { %v2611_v41 = vpop.f32.mrf.mxu0 }
 0x2f9   : > { %v2612_v43 = vadd.f32 %v2611_v41, %v2610_v40  ;;  %v1653_v45 = vmax.f32 %v1647_v42, 0.0  ;;  %v3043_v40 = vld [vmem:[%s3782_s9 + $0x18] sm:$0xff]   ;;  %v3044_v41 = vld [vmem:[%s3782_s9 + $0x10] sm:$0xff]   ;;  %v2567_v42 = vld [vmem:[#allocation2 + $0xa] ss:$0 sm:$0xff] }
 0x2fb   : > { %v1650_v44 = vadd.f32 %v2612_v43, %v2531_v39  ;;  %v3042_v39 = vld [vmem:[%s3782_s9 + $0x20] sm:$0xff]  }
 0x2fd   : > { %v1654_v46 = vmax.f32 %v1650_v44, 0.0 }
 0x2ff   : > { %v1671_v47 = vpack.c.bf16 %v1654_v46, %v1653_v45 }
 0x301   : > { %2666 = vmatmul.mubr.bf16.vlgmr.msra.gmra.mxu1 %v1671_v47 }
 0x302   : > { %2685 = vmatprep.mubr.msk.bf16.mxu1 %vm3219_vm0, %v3218_v2  ;;  %2682 = vmatpush3.bf16.msra.mxu1 %v3033_v61 }
 0x303   : > { %2683 = vmatprep.subr.bf16.mxu1 %v3218_v2 }
 0x306   : > { %2684 = vmatpush3.bf16.msra.mxu1 %v3034_v62 }
 0x307   : > { %2689 = vmatprep.subr.bf16.mxu1 %v3218_v2 }
 0x3c1   : > { %v1761_v52 = vpop.f32.mrf.mxu1 }
 0x3c2   : > { %v1762_v54 = vadd.f32 %v2548_v51, %v1761_v52 }
 0x3c3   : > { %v2667_v53 = vpop.f32.mrf.mxu1 }
 0x3c4   : > { %v1768_v58 = vmax.f32 %v1762_v54, 0.0 }
 0x3c5   : > { %v1764_v55 = vpop.f32.mrf.mxu1 }
 0x3c6   : > { %v1765_v56 = vadd.f32 %v2548_v51, %v1764_v55  ;;  %v3046_v55 = vld [vmem:[%s3782_s9] sm:$0xff]  }
 0x3c7   : > { %v2668_v57 = vpop.f32.mrf.mxu1 }
 0x3c8   : > { %v1769_v59 = vmax.f32 %v1765_v56, 0.0 }
 0x3ca   : > { %v1778_v60 = vpack.c.bf16 %v1769_v59, %v1768_v58 }
 0x3cc   : > { %2678 = vmatmul.mubr.msk.bf16.vlgmr.msra.gmra.mxu0 %vm1810_vm1, %v1778_v60 }
 0x3cd   : > { %2717 = vmatprep.mubr.msk.bf16.mxu0 %vm3219_vm0, %v3218_v2  ;;  %2702 = vmatpush3.bf16.msra.mxu0 %v3039_v36 }
 0x3ce   : > { %2703 = vmatprep.subr.bf16.mxu0 %v3218_v2 }
 0x3d1   : > { %2704 = vmatpush3.bf16.msra.mxu0 %v3040_v37 }
 0x3d2   : > { %2705 = vmatprep.subr.bf16.mxu0 %v3218_v2 }
 0x3d5   : > { %2706 = vmatpush3.bf16.msra.mxu0 %v3041_v38 }
 0x3d6   : > { %2707 = vmatprep.subr.bf16.mxu0 %v3218_v2 }
 0x3d9   : > { %2708 = vmatpush3.bf16.msra.mxu0 %v3042_v39 }
 0x3da   : > { %2709 = vmatprep.subr.bf16.mxu0 %v3218_v2 }
 0x3dd   : > { %2710 = vmatpush3.bf16.msra.mxu0 %v3043_v40 }
 0x3de   : > { %2711 = vmatprep.subr.bf16.mxu0 %v3218_v2 }
 0x3e1   : > { %2712 = vmatpush3.bf16.msra.mxu0 %v3044_v41 }
 0x3e2   : > { %2713 = vmatprep.subr.bf16.mxu0 %v3218_v2 }
 0x3e5   : > { %2714 = vmatpush3.bf16.msra.mxu0 %v3045_v50 }
 0x3e6   : > { %2715 = vmatprep.subr.bf16.mxu0 %v3218_v2 }
 0x3e9   : > { %2716 = vmatpush3.bf16.msra.mxu0 %v3046_v55 }
 0x48c   : > { %v1848_v63 = vpop.f32.mrf.mxu0 }
 0x48d   : > { %v1849_v6 = vadd.f32 %v2557_v0, %v1848_v63 }
 0x48e   : > { %v2679_v1 = vpop.f32.mrf.mxu0 }
 0x490   : > { %v1851_v3 = vpop.f32.mrf.mxu0 }
 0x491   : > { %v1852_v8 = vadd.f32 %v2557_v0, %v1851_v3 }
 0x492   : > { %v2680_v9 = vpop.f32.mrf.mxu0 }
 0x493   : > { %v1859_v10 = vpack.c.bf16 %v1852_v8, %v1849_v6 }
 0x495   : > { %2686 = vmatmul.mubr.msk.bf16.vlgmr.msra.gmra.mxu1 %vm1879_vm2, %v1859_v10  ;;  %v3047_v10 = vld [vmem:[#allocation9 + $0x18] sm:$0xff]  }
 0x496   : > { %2697 = vmatprep.mubr.msk.bf16.mxu1 %vm3219_vm0, %v3218_v2  ;;  %2690 = vmatpush3.bf16.msra.mxu1 %v3035_v11  ;;  %v3048_v11 = vld [vmem:[#allocation9 + $0x10] sm:$0xff]  }
 0x497   : > { %2691 = vmatprep.subr.bf16.mxu1 %v3218_v2 }
 0x49a   : > { %2692 = vmatpush3.bf16.msra.mxu1 %v3036_v12  ;;  %v3049_v12 = vld [vmem:[#allocation9 + $0x8] sm:$0xff]  }
 0x49b   : > { %2693 = vmatprep.subr.bf16.mxu1 %v3218_v2 }
 0x49e   : > { %2694 = vmatpush3.bf16.msra.mxu1 %v3037_v13  ;;  %v3050_v13 = vld [vmem:[#allocation9] sm:$0xff]  }
 0x49f   : > { %2695 = vmatprep.subr.bf16.mxu1 %v3218_v2 }
 0x4a2   : > { %2696 = vmatpush3.bf16.msra.mxu1 %v3038_v25 }
 0x4a3   : > { %2721 = vmatprep.subr.bf16.mxu1 %v3218_v2 }
 0x555   : > { %v1917_v15 = vpop.f32.mrf.mxu1 }
 0x556   : > { %v1918_v16 = vadd.f32 %v2563_v14, %v1917_v15 }
 0x557   : > { %v2687_v17 = vpop.f32.mrf.mxu1 }
 0x558   : > { %v1924_v18 = vadd.f32 3.0, %v1918_v16 }
 0x559   : > { %v1920_v19 = vpop.f32.mrf.mxu1 }
 0x55a   : > { %v1926_v20 = vmax.f32 %v1924_v18, 0.0  ;;  %v1921_v21 = vadd.f32 %v2563_v14, %v1920_v19  ;;  %v2573_v14 = vld [vmem:[#allocation2 + $0xb] ss:$0 sm:$0xff] }
 0x55b   : > { %v2688_v22 = vpop.f32.mrf.mxu1 }
 0x55c   : > { %v1928_v23 = vmin.f32 %v1926_v20, 6.0  ;;  %v1925_v24 = vadd.f32 3.0, %v1921_v21 }
 0x55e   : > { %v1927_v26 = vmax.f32 %v1925_v24, 0.0  ;;  %v1930_v27 = vmul.f32 %v1928_v23, %v1918_v16 }
 0x560   : > { %v1929_v7 = vmin.f32 %v1927_v26, 6.0  ;;  %v1932_v4 = vmul.f32 0.16666667, %v1930_v27 }
 0x562   : > { %v1931_v28 = vmul.f32 %v1929_v7, %v1921_v21 }
 0x564   : > { %v1933_v5 = vmul.f32 0.16666667, %v1931_v28 }
 0x566   : > { %v2800_v29 = vpack.i.bf16 %v1933_v5, %v1932_v4  ;;  %v2582_v5 = vld [vmem:[#allocation2 + $0xc] ss:$0 sm:$0xff] }
 0x568   : > { %2801 = vrot.lane.b32.xlu0 %v2800_v29, %s3220_s15 }
 0x5da   : > { %v2802_v30 = vpop.permute.xlu0 %2801 }
 0x5db   : > { %v2804_v31 = vunpack.i.h.bf16 %v2802_v30  ;;  %v2803_v32 = vunpack.i.l.bf16 %v2802_v30 }
 0x5dd   : > { %v1943_v33 = vsel %vm1879_vm2, %v1852_v8, %v2804_v31  ;;  %v1942_v34 = vsel %vm1879_vm2, %v1849_v6, %v2803_v32 }
 0x5de   : > { %v1952_v35 = vpack.c.bf16 %v1943_v33, %v1942_v34 }
 0x5e0   : > { %2698 = vmatmul.mubr.msk.bf16.vlgmr.msra.gmra.mxu1 %vm1810_vm1, %v1952_v35 }
 0x5e1   : > { %2729 = vmatprep.mubr.msk.bf16.mxu1 %vm3219_vm0, %v3218_v2  ;;  %2722 = vmatpush3.bf16.msra.mxu1 %v3047_v10 }
 0x5e2   : > { %2723 = vmatprep.subr.bf16.mxu1 %v3218_v2 }
 0x5e5   : > { %2724 = vmatpush3.bf16.msra.mxu1 %v3048_v11 }
 0x5e6   : > { %2725 = vmatprep.subr.bf16.mxu1 %v3218_v2 }
 0x5e9   : > { %2726 = vmatpush3.bf16.msra.mxu1 %v3049_v12 }
 0x5ea   : > { %2727 = vmatprep.subr.bf16.mxu1 %v3218_v2 }
 0x5ed   : > { %2728 = vmatpush3.bf16.msra.mxu1 %v3050_v13 }
 0x6a0   : > { %v2021_v43 = vpop.f32.mrf.mxu1 }
 0x6a1   : > { %v2022_v44 = vadd.f32 %v2567_v42, %v2021_v43 }
 0x6a2   : > { %v2699_v45 = vpop.f32.mrf.mxu1 }
 0x6a3   : > { %v2028_v46 = vadd.f32 3.0, %v2022_v44 }
 0x6a4   : > { %v2024_v47 = vpop.f32.mrf.mxu1 }
 0x6a5   : > { %v2030_v48 = vmax.f32 %v2028_v46, 0.0  ;;  %v2025_v49 = vadd.f32 %v2567_v42, %v2024_v47 }
 0x6a6   : > { %v2700_v51 = vpop.f32.mrf.mxu1 }
 0x6a7   : > { %v2032_v52 = vmin.f32 %v2030_v48, 6.0  ;;  %v2029_v53 = vadd.f32 3.0, %v2025_v49 }
 0x6a9   : > { %v2031_v54 = vmax.f32 %v2029_v53, 0.0  ;;  %v2034_v56 = vmul.f32 %v2032_v52, %v2022_v44 }
 0x6ab   : > { %v2033_v57 = vmin.f32 %v2031_v54, 6.0  ;;  %v2036_v59 = vmul.f32 0.16666667, %v2034_v56 }
 0x6ad   : > { %v2035_v58 = vmul.f32 %v2033_v57, %v2025_v49 }
 0x6af   : > { %v2037_v60 = vmul.f32 0.16666667, %v2035_v58 }
 0x6b1   : > { %v2805_v61 = vpack.i.bf16 %v2037_v60, %v2036_v59 }
 0x6b3   : > { %2806 = vrot.lane.b32.xlu0 %v2805_v61, %s3221_s19 }
 0x725   : > { %v2807_v62 = vpop.permute.xlu0 %2806 }
 0x726   : > { %v2809_v63 = vunpack.i.h.bf16 %v2807_v62  ;;  %v2808_v0 = vunpack.i.l.bf16 %v2807_v62 }
 0x728   : > { %v2047_v1 = vsel %vm1810_vm1, %v1943_v33, %v2809_v63  ;;  %v2046_v3 = vsel %vm1810_vm1, %v1942_v34, %v2808_v0 }
 0x729   : > { %v2049_v6 = vmax.f32 %v2047_v1, 0.0  ;;  %v2048_v8 = vmax.f32 %v2046_v3, 0.0 }
 0x72b   : > { %v2066_v9 = vpack.c.bf16 %v2049_v6, %v2048_v8 }
 0x72d   : > { %2718 = vmatmul.mubr.bf16.vlgmr.msra.gmra.mxu0 %v2066_v9 }
 0x7ed   : > { %v2156_v15 = vpop.f32.mrf.mxu0 }
 0x7ee   : > { %v2157_v16 = vadd.f32 %v2573_v14, %v2156_v15 }
 0x7ef   : > { %v2719_v17 = vpop.f32.mrf.mxu0 }
 0x7f0   : > { %v2163_v18 = vadd.f32 3.0, %v2157_v16 }
 0x7f1   : > { %v2159_v19 = vpop.f32.mrf.mxu0 }
 0x7f2   : > { %v2165_v20 = vmax.f32 %v2163_v18, 0.0  ;;  %v2160_v21 = vadd.f32 %v2573_v14, %v2159_v19 }
 0x7f3   : > { %v2720_v22 = vpop.f32.mrf.mxu0 }
 0x7f4   : > { %v2167_v23 = vmin.f32 %v2165_v20, 6.0  ;;  %v2164_v24 = vadd.f32 3.0, %v2160_v21 }
 0x7f6   : > { %v2166_v25 = vmax.f32 %v2164_v24, 0.0  ;;  %v2169_v26 = vmul.f32 %v2167_v23, %v2157_v16 }
 0x7f8   : > { %v2168_v27 = vmin.f32 %v2166_v25, 6.0  ;;  %v2171_v28 = vmul.f32 0.16666667, %v2169_v26 }
 0x7fa   : > { %v2170_v7 = vmul.f32 %v2168_v27, %v2160_v21 }
 0x7fc   : > { %v2172_v4 = vmul.f32 0.16666667, %v2170_v7 }
 0x7fe   : > { %v2181_v2 = vpack.c.bf16 %v2172_v4, %v2171_v28 }
 0x800   : > { %2730 = vmatmul.mubr.msk.bf16.vlgmr.msra.gmra.mxu1 %vm1810_vm1, %v2181_v2 }
 0x8c0   : > { %v2250_v29 = vpop.f32.mrf.mxu1 }
 0x8c1   : > { %v2251_v30 = vadd.f32 %v2582_v5, %v2250_v29 }
 0x8c2   : > { %v2731_v31 = vpop.f32.mrf.mxu1 }
 0x8c3   : > { %v2257_v32 = vmul.f32 0.5, %v2251_v30 }
 0x8c4   : > { %v2253_v33 = vpop.f32.mrf.mxu1 }
 0x8c5   : > { %3051 = vtanh.f32 %v2257_v32  ;;  %v2254_v34 = vadd.f32 %v2582_v5, %v2253_v33 }
 0x8c6   : > { %v2732_v35 = vpop.f32.mrf.mxu1 }
 0x8c7   : > { %v2258_v36 = vmul.f32 0.5, %v2254_v34 }
 0x8c9   : > { %3053 = vtanh.f32 %v2258_v36 }
 0x8d2   : > { %v3052_v37 = vpop.eup %3051 }
 0x8d3   : > { %v2261_v38 = vmul.f32 %v3052_v37, %v3052_v37 }
 0x8d5   : > { %2263 = vadd.xlane.f32.xlu1 %v2261_v38 }
 0x8d6   : > { %v3054_v39 = vpop.eup %3053 }
 0x8d7   : > { %v2262_v40 = vmul.f32 %v3054_v39, %v3054_v39 }
 0x8d9   : > { %2265 = vadd.xlane.f32.xlu1 %v2262_v40 }
 0x95e   : > { %v2264_v41 = vpop.xlane.xlu1 %2263 }
 0x95f   : > { %v2267_v42 = vadd.f32 1e-12, %v2264_v41 }
 0x961   : > { %3055 = vrsqrt.f32 %v2267_v42 }
 0x962   : > { %v2266_v43 = vpop.xlane.xlu1 %2265 }
 0x963   : > { %v2268_v44 = vadd.f32 1e-12, %v2266_v43 }
 0x965   : > { %3057 = vrsqrt.f32 %v2268_v44 }
 0x96e   : > { %v3056_v45 = vpop.eup %3055 }
 0x96f   : > { %v2271_v46 = vmul.f32 %v3056_v45, %v3052_v37 }
 0x971   : > { %2273 = vst [vmem:[%s462_s26] sm:$0xff] %v2271_v46 }
 0x972   : > { %v3058_v47 = vpop.eup %3057 }
 0x973   : > { %v2272_v48 = vmul.f32 %v3058_v47, %v3054_v39 }
 0x975   : > { %2274 = vst [vmem:[%s462_s26 + $0x8] sm:$0xff] %v2272_v48 }
 0x976 PF: > { %s24_s17 = sadd.s32 1, %s3207_s17  }
 0x977   : > { %p21_p3 = scmp.ge.s32.totalorder %s24_s17, 4  }
 0x979   :  { %23 = sbr.rel (!%p21_p3) target bundleno = 3 (0x3), region = 115 }
 0x97e   :  { %2297 = vsyncpa [#allocation3], 1 }
 0x97f   :  { %2299 = vsyncpa [#allocation3 + $0x1], 1 }
 0x980   :  { %2300 = vsyncpa [#allocation5], 1 }
 0x981   :  { %2301 = vsyncpa [#allocation8], 1 }

</bundles_post_ra>
